<compile_context>
chip_gen: v5e
topology: v5e:2x2
jax: 0.10.0
libtpu: 0.0.40
codegen_flags: <defaults>
</compile_context>

<pallas_src>
import math
import jax
import jax.numpy as jnp
from jax.experimental import pallas as pl
from jax.experimental.pallas import tpu as pltpu

# ---------------- model hyper-params (small, consistent with the module) --------------
B        = 2     # batch
S_TRG    = 8     # target sequence length
S_SRC    = 16    # source (encoder) sequence length
HID      = 32    # hid_dim
N_HEADS  = 4     # n_heads
HEAD_DIM = HID // N_HEADS
PF_DIM   = 64    # pf_dim
EPS      = 1e-5  # nn.LayerNorm default eps
INV_SCALE = 1.0 / math.sqrt(float(HEAD_DIM))

# bf16 MXU inputs (v6e/v7x bf16-native MXU, halves weight DMA bytes); accumulate in f32.
MATMUL_DTYPE = jnp.bfloat16

# TODO(synk): nn.Dropout is a no-op at inference; dropout masks are not modelled here.


# ------------------------------- the Pallas kernel ------------------------------------
def decoder_layer_kernel(
    trg_ref, enc_ref,                      # activations (per-batch blocks)
    ln_ref,                                # (2, HID): row 0 = gamma, row 1 = beta
    wqkv_s_ref, wo_s_ref, b_s_ref,         # self-attention  (fused QKV, head-split O, bias slab)
    wqkv_c_ref, wo_c_ref, b_c_ref,         # encoder(cross)-attention
    w1_ref, w2_ref, bff_ref,               # position-wise FFN (bias slab = [b1 | b2])
    out_ref, attn_ref,                     # outputs
):
    f32 = jnp.float32
    trg = trg_ref[0]            # (S_TRG, HID) f32
    enc = enc_ref[0]            # (S_SRC, HID) f32

    ln = ln_ref[...]
    gamma = ln[0:1, :]          # (1, HID)
    beta = ln[1:2, :]

    def layer_norm(x):
        mu = jnp.mean(x, axis=-1, keepdims=True)
        xc = x - mu
        var = jnp.mean(xc * xc, axis=-1, keepdims=True)
        return xc * jax.lax.rsqrt(var + EPS) * gamma + beta

    def split_heads(slab, base):
        # slab: (S, 3*HID) f32  ->  (N_HEADS, S, HEAD_DIM); static lane slices + leading stack
        return jnp.stack(
            [slab[:, base + h * HEAD_DIM: base + (h + 1) * HEAD_DIM]
             for h in range(N_HEADS)], axis=0)

    def mha(q_in, kv_in, wqkv_ref, wo_ref, b_ref, self_attn):
        wqkv = wqkv_ref[...]                 # (HID, 3*HID) bf16  = [Wq | Wk | Wv]
        bias = b_ref[...]                    # (1, 4*HID)   f32   = [bq | bk | bv | bo]
        b_qkv = bias[:, :3 * HID]
        b_o = bias[:, 3 * HID:]

        # fused QKV projection: one MXU pass per distinct input tensor
        q_slab = jnp.dot(q_in.astype(MATMUL_DTYPE), wqkv,
                         preferred_element_type=f32) + b_qkv           # (Sq, 3*HID)
        if self_attn:
            kv_slab = q_slab
        else:
            kv_slab = jnp.dot(kv_in.astype(MATMUL_DTYPE), wqkv,
                              preferred_element_type=f32) + b_qkv      # (Sk, 3*HID)

        q3 = split_heads(q_slab, 0) * INV_SCALE   # (H, Sq, D); 1/sqrt(d) folded into Q
        k3 = split_heads(kv_slab, HID)            # (H, Sk, D)
        v3 = split_heads(kv_slab, 2 * HID)        # (H, Sk, D)

        # batched-head score / softmax / context
        scores = jnp.einsum('hqd,hkd->hqk',
                            q3.astype(MATMUL_DTYPE), k3.astype(MATMUL_DTYPE),
                            preferred_element_type=f32)                # (H, Sq, Sk)
        scores = scores - jnp.max(scores, axis=-1, keepdims=True)
        e = jnp.exp(scores)
        denom = jnp.sum(e, axis=-1, keepdims=True)
        attn = e * pl.reciprocal(denom, approx=True)                   # softmax (EUP recip)

        ctx = jnp.einsum('hqk,hkd->hqd',
                         attn.astype(MATMUL_DTYPE), v3.astype(MATMUL_DTYPE),
                         preferred_element_type=f32)                   # (H, Sq, D)

        # fused O-projection: batched per-head dot, then reduce over heads
        out_h = jnp.einsum('hqd,hdo->hqo',
                           ctx.astype(MATMUL_DTYPE), wo_ref[...],
                           preferred_element_type=f32)                 # (H, Sq, HID)
        out = jnp.sum(out_h, axis=0) + b_o                             # (Sq, HID)
        return out, attn

    # ---- self attention + residual + LayerNorm ----
    sa_out, _ = mha(trg, trg, wqkv_s_ref, wo_s_ref, b_s_ref, True)
    t1 = layer_norm(trg + sa_out)

    # ---- encoder (cross) attention + residual + LayerNorm ----
    ca_out, attn = mha(t1, enc, wqkv_c_ref, wo_c_ref, b_c_ref, False)
    t2 = layer_norm(t1 + ca_out)

    # ---- position-wise feedforward + residual + LayerNorm ----
    bff = bff_ref[...]
    b1 = bff[:, :PF_DIM]
    b2 = bff[:, PF_DIM:]
    h = jnp.maximum(jnp.dot(t2.astype(MATMUL_DTYPE), w1_ref[...],
                            preferred_element_type=f32) + b1, 0.0)
    ff = jnp.dot(h.astype(MATMUL_DTYPE), w2_ref[...],
                 preferred_element_type=f32) + b2
    t3 = layer_norm(t2 + ff)

    out_ref[0] = t3        # single store site
    attn_ref[0] = attn     # single store site (all 4 heads at once)


# ----------------------------------- wrapper -------------------------------------------
def decoder_layer(trg, enc_src, params):
    """trg: (B, S_TRG, HID) f32, enc_src: (B, S_SRC, HID) f32."""
    (ln_g, ln_b,
     sq_w, sq_b, sk_w, sk_b, sv_w, sv_b, so_w, so_b,
     eq_w, eq_b, ek_w, ek_b, ev_w, ev_b, eo_w, eo_b,
     f1_w, f1_b, f2_w, f2_b) = params

    # --- wrapper-side packing (free XLA layout plumbing) ---
    ln = jnp.concatenate([ln_g, ln_b], axis=0)                                   # (2, HID)
    wqkv_s = jnp.concatenate([sq_w, sk_w, sv_w], axis=1).astype(MATMUL_DTYPE)    # (HID, 3*HID)
    wo_s = so_w.reshape(N_HEADS, HEAD_DIM, HID).astype(MATMUL_DTYPE)             # (H, D, HID)
    b_s = jnp.concatenate([sq_b, sk_b, sv_b, so_b], axis=1)                      # (1, 4*HID)
    wqkv_c = jnp.concatenate([eq_w, ek_w, ev_w], axis=1).astype(MATMUL_DTYPE)
    wo_c = eo_w.reshape(N_HEADS, HEAD_DIM, HID).astype(MATMUL_DTYPE)
    b_c = jnp.concatenate([eq_b, ek_b, ev_b, eo_b], axis=1)
    w1 = f1_w.astype(MATMUL_DTYPE)
    w2 = f2_w.astype(MATMUL_DTYPE)
    bff = jnp.concatenate([f1_b, f2_b], axis=1)                                  # (1, PF_DIM+HID)

    def full(shape):
        return pl.BlockSpec(shape, lambda b: (0,) * len(shape))

    in_specs = [
        pl.BlockSpec((1, S_TRG, HID), lambda b: (b, 0, 0)),
        pl.BlockSpec((1, S_SRC, HID), lambda b: (b, 0, 0)),
        full((2, HID)),
        full((HID, 3 * HID)), full((N_HEADS, HEAD_DIM, HID)), full((1, 4 * HID)),
        full((HID, 3 * HID)), full((N_HEADS, HEAD_DIM, HID)), full((1, 4 * HID)),
        full((HID, PF_DIM)), full((PF_DIM, HID)), full((1, PF_DIM + HID)),
    ]
    out_specs = [
        pl.BlockSpec((1, S_TRG, HID), lambda b: (b, 0, 0)),
        pl.BlockSpec((1, N_HEADS, S_TRG, S_SRC), lambda b: (b, 0, 0, 0)),
    ]
    out_shape = [
        jax.ShapeDtypeStruct((B, S_TRG, HID), jnp.float32),
        jax.ShapeDtypeStruct((B, N_HEADS, S_TRG, S_SRC), jnp.float32),
    ]

    return pl.pallas_call(
        decoder_layer_kernel,
        grid_spec=pltpu.PrefetchScalarGridSpec(
            num_scalar_prefetch=0,
            grid=(B,),
            in_specs=in_specs,
            out_specs=out_specs,
        ),
        out_shape=out_shape,
        # Batch stays a parallel grid axis: on v7x the two TensorCores each take one
        # batch element; on v6e this is a wash; on v5e the batch could be folded into
        # a single grid step to save ~0.35us/step of fixed overhead.
        compiler_params=pltpu.CompilerParams(dimension_semantics=("parallel",)),
    )(trg, enc_src, ln, wqkv_s, wo_s, b_s, wqkv_c, wo_c, b_c, w1, w2, bff)


# --------------------------- pure-JAX reference (for checking) -------------------------
def reference_decoder_layer(trg, enc_src, params):
    (ln_g, ln_b,
     sq_w, sq_b, sk_w, sk_b, sv_w, sv_b, so_w, so_b,
     eq_w, eq_b, ek_w, ek_b, ev_w, ev_b, eo_w, eo_b,
     f1_w, f1_b, f2_w, f2_b) = params

    scale = math.sqrt(float(HEAD_DIM))

    def ln(x):
        mu = jnp.mean(x, axis=-1, keepdims=True)
        var = jnp.mean((x - mu) ** 2, axis=-1, keepdims=True)
        return (x - mu) / jnp.sqrt(var + EPS) * ln_g[0] + ln_b[0]

    def mha(q, k, v, wq, bq, wk, bk, wv, bv, wo, bo):
        Bq, Sq, _ = q.shape
        Sk = k.shape[1]
        Q = (q @ wq + bq).reshape(Bq, Sq, N_HEADS, HEAD_DIM).transpose(0, 2, 1, 3)
        K = (k @ wk + bk).reshape(Bq, Sk, N_HEADS, HEAD_DIM).transpose(0, 2, 1, 3)
        V = (v @ wv + bv).reshape(Bq, Sk, N_HEADS, HEAD_DIM).transpose(0, 2, 1, 3)
        energy = jnp.einsum('bhqd,bhkd->bhqk', Q, K) / scale
        attn = jax.nn.softmax(energy, axis=-1)
        x = jnp.einsum('bhqk,bhkd->bhqd', attn, V)
        x = x.transpose(0, 2, 1, 3).reshape(Bq, Sq, HID)
        return x @ wo + bo, attn

    sa, _ = mha(trg, trg, trg, sq_w, sq_b[0], sk_w, sk_b[0], sv_w, sv_b[0], so_w, so_b[0])
    t1 = ln(trg + sa)
    ca, attn = mha(t1, enc_src, enc_src, eq_w, eq_b[0], ek_w, ek_b[0], ev_w, ev_b[0], eo_w, eo_b[0])
    t2 = ln(t1 + ca)
    ff = jnp.maximum(t2 @ f1_w + f1_b[0], 0.0) @ f2_w + f2_b[0]
    t3 = ln(t2 + ff)
    return t3, attn


# ------------------------------------ main ---------------------------------------------
if __name__ == "__main__":
    key = jax.random.PRNGKey(0)
    ks = jax.random.split(key, 32)
    ki = iter(range(32))

    def w(shape, scale=0.1):
        return (scale * jax.random.normal(ks[next(ki)], shape)).astype(jnp.float32)

    trg = w((B, S_TRG, HID), 1.0)
    enc_src = w((B, S_SRC, HID), 1.0)

    ln_g = jnp.ones((1, HID), jnp.float32)
    ln_b = jnp.zeros((1, HID), jnp.float32)

    def linear_params(din, dout):
        return w((din, dout)), w((1, dout))

    params = [ln_g, ln_b]
    for _ in range(2):                       # self-attn then cross-attn: q, k, v, o
        for _ in range(4):
            W, bb = linear_params(HID, HID)
            params += [W, bb]
    W1, b1 = linear_params(HID, PF_DIM)
    W2, b2 = linear_params(PF_DIM, HID)
    params += [W1, b1, W2, b2]

    out, attn = decoder_layer(trg, enc_src, params)
    out = jax.block_until_ready(out)
    attn = jax.block_until_ready(attn)

    ref_out, ref_attn = reference_decoder_layer(trg, enc_src, params)
    assert out.shape == (B, S_TRG, HID)
    assert attn.shape == (B, N_HEADS, S_TRG, S_SRC)
    # bf16 matmul inputs + approx reciprocal -> relaxed tolerances vs. the f32 reference
    assert jnp.allclose(out, ref_out, atol=2e-2, rtol=2e-2)
    assert jnp.allclose(attn, ref_attn, atol=1e-2, rtol=1e-2)

    print("KERNEL_OK")
</pallas_src>

<mosaic_0001>
module attributes {stable_mosaic.version = 11 : i64} {
  func.func @decoder_layer_kernel(%arg0: i32, %arg1: memref<1x8x32xf32, #tpu.memory_space<vmem>>, %arg2: memref<1x16x32xf32, #tpu.memory_space<vmem>>, %arg3: memref<2x32xf32, #tpu.memory_space<vmem>>, %arg4: memref<32x96xbf16, #tpu.memory_space<vmem>>, %arg5: memref<4x8x32xbf16, #tpu.memory_space<vmem>>, %arg6: memref<1x128xf32, #tpu.memory_space<vmem>>, %arg7: memref<32x96xbf16, #tpu.memory_space<vmem>>, %arg8: memref<4x8x32xbf16, #tpu.memory_space<vmem>>, %arg9: memref<1x128xf32, #tpu.memory_space<vmem>>, %arg10: memref<32x64xbf16, #tpu.memory_space<vmem>>, %arg11: memref<64x32xbf16, #tpu.memory_space<vmem>>, %arg12: memref<1x96xf32, #tpu.memory_space<vmem>>, %arg13: memref<1x8x32xf32, #tpu.memory_space<vmem>>, %arg14: memref<1x4x8x16xf32, #tpu.memory_space<vmem>>) attributes {dimension_semantics = [#tpu.dimension_semantics<parallel>], iteration_bounds = array<i64: 2>, scalar_prefetch = 0 : i64, scratch_operands = 0 : i64, tpu.core_type = #tpu.core_type<tc>, window_params = [{transform_indices = @transform_0, window_bounds = array<i64: 1, 8, 32>}, {transform_indices = @transform_1, window_bounds = array<i64: 1, 16, 32>}, {pipeline_mode = #tpu.pipeline_mode<synchronous>, transform_indices = @transform_2, window_bounds = array<i64: 2, 32>}, {pipeline_mode = #tpu.pipeline_mode<synchronous>, transform_indices = @transform_3, window_bounds = array<i64: 32, 96>}, {pipeline_mode = #tpu.pipeline_mode<synchronous>, transform_indices = @transform_4, window_bounds = array<i64: 4, 8, 32>}, {pipeline_mode = #tpu.pipeline_mode<synchronous>, transform_indices = @transform_5, window_bounds = array<i64: 1, 128>}, {pipeline_mode = #tpu.pipeline_mode<synchronous>, transform_indices = @transform_6, window_bounds = array<i64: 32, 96>}, {pipeline_mode = #tpu.pipeline_mode<synchronous>, transform_indices = @transform_7, window_bounds = array<i64: 4, 8, 32>}, {pipeline_mode = #tpu.pipeline_mode<synchronous>, transform_indices = @transform_8, window_bounds = array<i64: 1, 128>}, {pipeline_mode = #tpu.pipeline_mode<synchronous>, transform_indices = @transform_9, window_bounds = array<i64: 32, 64>}, {pipeline_mode = #tpu.pipeline_mode<synchronous>, transform_indices = @transform_10, window_bounds = array<i64: 64, 32>}, {pipeline_mode = #tpu.pipeline_mode<synchronous>, transform_indices = @transform_11, window_bounds = array<i64: 1, 96>}, {transform_indices = @transform_12, window_bounds = array<i64: 1, 8, 32>}, {transform_indices = @transform_13, window_bounds = array<i64: 1, 4, 8, 16>}]} {
    %c0 = arith.constant 0 : index
    %c0_0 = arith.constant 0 : index
    %c0_1 = arith.constant 0 : index
    %0 = vector.load %arg1[%c0, %c0_0, %c0_1] : memref<1x8x32xf32, #tpu.memory_space<vmem>>, vector<1x8x32xf32>
    %1 = vector.shape_cast %0 : vector<1x8x32xf32> to vector<8x32xf32>
    %c0_2 = arith.constant 0 : index
    %c0_3 = arith.constant 0 : index
    %c0_4 = arith.constant 0 : index
    %2 = vector.load %arg2[%c0_2, %c0_3, %c0_4] : memref<1x16x32xf32, #tpu.memory_space<vmem>>, vector<1x16x32xf32>
    %3 = vector.shape_cast %2 : vector<1x16x32xf32> to vector<16x32xf32>
    %c0_5 = arith.constant 0 : index
    %c0_6 = arith.constant 0 : index
    %4 = vector.load %arg3[%c0_5, %c0_6] : memref<2x32xf32, #tpu.memory_space<vmem>>, vector<2x32xf32>
    %5 = vector.extract_strided_slice %4 {offsets = [0, 0], sizes = [1, 32], strides = [1, 1]} : vector<2x32xf32> to vector<1x32xf32>
    %6 = vector.extract_strided_slice %4 {offsets = [1, 0], sizes = [1, 32], strides = [1, 1]} : vector<2x32xf32> to vector<1x32xf32>
    %c0_7 = arith.constant 0 : index
    %c0_8 = arith.constant 0 : index
    %7 = vector.load %arg4[%c0_7, %c0_8] : memref<32x96xbf16, #tpu.memory_space<vmem>>, vector<32x96xbf16>
    %c0_9 = arith.constant 0 : index
    %c0_10 = arith.constant 0 : index
    %8 = vector.load %arg6[%c0_9, %c0_10] : memref<1x128xf32, #tpu.memory_space<vmem>>, vector<1x128xf32>
    %9 = vector.extract_strided_slice %8 {offsets = [0, 0], sizes = [1, 96], strides = [1, 1]} : vector<1x128xf32> to vector<1x96xf32>
    %10 = vector.extract_strided_slice %8 {offsets = [0, 96], sizes = [1, 32], strides = [1, 1]} : vector<1x128xf32> to vector<1x32xf32>
    %11 = arith.truncf %1 : vector<8x32xf32> to vector<8x32xbf16>
    %cst = arith.constant dense<0.000000e+00> : vector<8x96xf32>
    %12 = tpu.matmul %11, %7, %cst {dimension_numbers = #tpu.dot_dimension_numbers<[1], [0], [0], [1], [0, 0, 1, 1], [], []>} : vector<8x32xbf16>, vector<32x96xbf16>, vector<8x96xf32> -> vector<8x96xf32>
    %13 = vector.broadcast %9 : vector<1x96xf32> to vector<8x96xf32>
    %14 = arith.addf %12, %13 : vector<8x96xf32>
    %15 = vector.extract_strided_slice %14 {offsets = [0, 0], sizes = [8, 8], strides = [1, 1]} : vector<8x96xf32> to vector<8x8xf32>
    %16 = vector.extract_strided_slice %14 {offsets = [0, 8], sizes = [8, 8], strides = [1, 1]} : vector<8x96xf32> to vector<8x8xf32>
    %17 = vector.extract_strided_slice %14 {offsets = [0, 16], sizes = [8, 8], strides = [1, 1]} : vector<8x96xf32> to vector<8x8xf32>
    %18 = vector.extract_strided_slice %14 {offsets = [0, 24], sizes = [8, 8], strides = [1, 1]} : vector<8x96xf32> to vector<8x8xf32>
    %19 = vector.shape_cast %15 : vector<8x8xf32> to vector<1x8x8xf32>
    %20 = vector.shape_cast %16 : vector<8x8xf32> to vector<1x8x8xf32>
    %21 = vector.shape_cast %17 : vector<8x8xf32> to vector<1x8x8xf32>
    %22 = vector.shape_cast %18 : vector<8x8xf32> to vector<1x8x8xf32>
    %23 = tpu.concatenate %19, %20, %21, %22 in 0 : vector<1x8x8xf32>, vector<1x8x8xf32>, vector<1x8x8xf32>, vector<1x8x8xf32> -> vector<4x8x8xf32>
    %cst_11 = arith.constant 0.353553385 : f32
    %24 = vector.broadcast %cst_11 : f32 to vector<4x8x8xf32>
    %25 = arith.mulf %23, %24 : vector<4x8x8xf32>
    %26 = vector.extract_strided_slice %14 {offsets = [0, 32], sizes = [8, 8], strides = [1, 1]} : vector<8x96xf32> to vector<8x8xf32>
    %27 = vector.extract_strided_slice %14 {offsets = [0, 40], sizes = [8, 8], strides = [1, 1]} : vector<8x96xf32> to vector<8x8xf32>
    %28 = vector.extract_strided_slice %14 {offsets = [0, 48], sizes = [8, 8], strides = [1, 1]} : vector<8x96xf32> to vector<8x8xf32>
    %29 = vector.extract_strided_slice %14 {offsets = [0, 56], sizes = [8, 8], strides = [1, 1]} : vector<8x96xf32> to vector<8x8xf32>
    %30 = vector.shape_cast %26 : vector<8x8xf32> to vector<1x8x8xf32>
    %31 = vector.shape_cast %27 : vector<8x8xf32> to vector<1x8x8xf32>
    %32 = vector.shape_cast %28 : vector<8x8xf32> to vector<1x8x8xf32>
    %33 = vector.shape_cast %29 : vector<8x8xf32> to vector<1x8x8xf32>
    %34 = tpu.concatenate %30, %31, %32, %33 in 0 : vector<1x8x8xf32>, vector<1x8x8xf32>, vector<1x8x8xf32>, vector<1x8x8xf32> -> vector<4x8x8xf32>
    %35 = vector.extract_strided_slice %14 {offsets = [0, 64], sizes = [8, 8], strides = [1, 1]} : vector<8x96xf32> to vector<8x8xf32>
    %36 = vector.extract_strided_slice %14 {offsets = [0, 72], sizes = [8, 8], strides = [1, 1]} : vector<8x96xf32> to vector<8x8xf32>
    %37 = vector.extract_strided_slice %14 {offsets = [0, 80], sizes = [8, 8], strides = [1, 1]} : vector<8x96xf32> to vector<8x8xf32>
    %38 = vector.extract_strided_slice %14 {offsets = [0, 88], sizes = [8, 8], strides = [1, 1]} : vector<8x96xf32> to vector<8x8xf32>
    %39 = vector.shape_cast %35 : vector<8x8xf32> to vector<1x8x8xf32>
    %40 = vector.shape_cast %36 : vector<8x8xf32> to vector<1x8x8xf32>
    %41 = vector.shape_cast %37 : vector<8x8xf32> to vector<1x8x8xf32>
    %42 = vector.shape_cast %38 : vector<8x8xf32> to vector<1x8x8xf32>
    %43 = tpu.concatenate %39, %40, %41, %42 in 0 : vector<1x8x8xf32>, vector<1x8x8xf32>, vector<1x8x8xf32>, vector<1x8x8xf32> -> vector<4x8x8xf32>
    %44 = arith.truncf %25 : vector<4x8x8xf32> to vector<4x8x8xbf16>
    %45 = arith.truncf %34 : vector<4x8x8xf32> to vector<4x8x8xbf16>
    "tpu.trace_start"() <{level = 10 : i32, message = "hqd,hkd->hqk"}> : () -> ()
    %cst_12 = arith.constant dense<0.000000e+00> : vector<4x8x8xf32>
    %46 = tpu.matmul %44, %45, %cst_12 {dimension_numbers = #tpu.dot_dimension_numbers<[2], [2], [1], [1], [0, 0, 0, 1, 1, 1], [0], [0]>} : vector<4x8x8xbf16>, vector<4x8x8xbf16>, vector<4x8x8xf32> -> vector<4x8x8xf32>
    "tpu.trace_stop"() : () -> ()
    %cst_13 = arith.constant dense<0xFF800000> : vector<4x8xf32>
    %47 = vector.multi_reduction <maximumf>, %46, %cst_13 [2] : vector<4x8x8xf32> to vector<4x8xf32>
    %48 = vector.shape_cast %47 : vector<4x8xf32> to vector<4x8x1xf32>
    %49 = vector.broadcast %48 : vector<4x8x1xf32> to vector<4x8x8xf32>
    %50 = arith.subf %46, %49 : vector<4x8x8xf32>
    %51 = math.exp %50 : vector<4x8x8xf32>
    %cst_14 = arith.constant dense<0.000000e+00> : vector<4x8xf32>
    %52 = vector.multi_reduction <add>, %51, %cst_14 [2] : vector<4x8x8xf32> to vector<4x8xf32>
    %53 = vector.shape_cast %52 : vector<4x8xf32> to vector<4x8x1xf32>
    %54 = tpu.reciprocal %53 {approx = true} : vector<4x8x1xf32> -> vector<4x8x1xf32>
    %55 = vector.broadcast %54 : vector<4x8x1xf32> to vector<4x8x8xf32>
    %56 = arith.mulf %51, %55 : vector<4x8x8xf32>
    %57 = arith.truncf %56 : vector<4x8x8xf32> to vector<4x8x8xbf16>
    %58 = arith.truncf %43 : vector<4x8x8xf32> to vector<4x8x8xbf16>
    "tpu.trace_start"() <{level = 10 : i32, message = "hqk,hkd->hqd"}> : () -> ()
    %cst_15 = arith.constant dense<0.000000e+00> : vector<4x8x8xf32>
    %59 = tpu.matmul %57, %58, %cst_15 {dimension_numbers = #tpu.dot_dimension_numbers<[2], [1], [1], [2], [0, 0, 0, 1, 1, 2], [0], [0]>} : vector<4x8x8xbf16>, vector<4x8x8xbf16>, vector<4x8x8xf32> -> vector<4x8x8xf32>
    "tpu.trace_stop"() : () -> ()
    %60 = arith.truncf %59 : vector<4x8x8xf32> to vector<4x8x8xbf16>
    %c0_16 = arith.constant 0 : index
    %c0_17 = arith.constant 0 : index
    %c0_18 = arith.constant 0 : index
    %61 = vector.load %arg5[%c0_16, %c0_17, %c0_18] : memref<4x8x32xbf16, #tpu.memory_space<vmem>>, vector<4x8x32xbf16>
    "tpu.trace_start"() <{level = 10 : i32, message = "hqd,hdo->hqo"}> : () -> ()
    %cst_19 = arith.constant dense<0.000000e+00> : vector<4x8x32xf32>
    %62 = tpu.matmul %60, %61, %cst_19 {dimension_numbers = #tpu.dot_dimension_numbers<[2], [1], [1], [2], [0, 0, 0, 1, 1, 2], [0], [0]>} : vector<4x8x8xbf16>, vector<4x8x32xbf16>, vector<4x8x32xf32> -> vector<4x8x32xf32>
    "tpu.trace_stop"() : () -> ()
    %cst_20 = arith.constant dense<0.000000e+00> : vector<8x32xf32>
    %63 = vector.multi_reduction <add>, %62, %cst_20 [0] : vector<4x8x32xf32> to vector<8x32xf32>
    %64 = vector.broadcast %10 : vector<1x32xf32> to vector<8x32xf32>
    %65 = arith.addf %63, %64 : vector<8x32xf32>
    %66 = arith.addf %1, %65 : vector<8x32xf32>
    %cst_21 = arith.constant dense<0.000000e+00> : vector<8xf32>
    %67 = vector.multi_reduction <add>, %66, %cst_21 [1] : vector<8x32xf32> to vector<8xf32>
    %68 = vector.shape_cast %67 : vector<8xf32> to vector<8x1xf32>
    %cst_22 = arith.constant 3.200000e+01 : f32
    %69 = vector.broadcast %cst_22 : f32 to vector<8x1xf32>
    %70 = arith.divf %68, %69 : vector<8x1xf32>
    %71 = vector.broadcast %70 : vector<8x1xf32> to vector<8x32xf32>
    %72 = arith.subf %66, %71 : vector<8x32xf32>
    %73 = arith.mulf %72, %72 : vector<8x32xf32>
    %cst_23 = arith.constant dense<0.000000e+00> : vector<8xf32>
    %74 = vector.multi_reduction <add>, %73, %cst_23 [1] : vector<8x32xf32> to vector<8xf32>
    %75 = vector.shape_cast %74 : vector<8xf32> to vector<8x1xf32>
    %cst_24 = arith.constant 3.200000e+01 : f32
    %76 = vector.broadcast %cst_24 : f32 to vector<8x1xf32>
    %77 = arith.divf %75, %76 : vector<8x1xf32>
    %cst_25 = arith.constant 9.99999974E-6 : f32
    %78 = vector.broadcast %cst_25 : f32 to vector<8x1xf32>
    %79 = arith.addf %77, %78 : vector<8x1xf32>
    %80 = math.rsqrt %79 : vector<8x1xf32>
    %81 = vector.broadcast %80 : vector<8x1xf32> to vector<8x32xf32>
    %82 = arith.mulf %72, %81 : vector<8x32xf32>
    %83 = vector.broadcast %5 : vector<1x32xf32> to vector<8x32xf32>
    %84 = arith.mulf %82, %83 : vector<8x32xf32>
    %85 = vector.broadcast %6 : vector<1x32xf32> to vector<8x32xf32>
    %86 = arith.addf %84, %85 : vector<8x32xf32>
    %c0_26 = arith.constant 0 : index
    %c0_27 = arith.constant 0 : index
    %87 = vector.load %arg7[%c0_26, %c0_27] : memref<32x96xbf16, #tpu.memory_space<vmem>>, vector<32x96xbf16>
    %c0_28 = arith.constant 0 : index
    %c0_29 = arith.constant 0 : index
    %88 = vector.load %arg9[%c0_28, %c0_29] : memref<1x128xf32, #tpu.memory_space<vmem>>, vector<1x128xf32>
    %89 = vector.extract_strided_slice %88 {offsets = [0, 0], sizes = [1, 96], strides = [1, 1]} : vector<1x128xf32> to vector<1x96xf32>
    %90 = vector.extract_strided_slice %88 {offsets = [0, 96], sizes = [1, 32], strides = [1, 1]} : vector<1x128xf32> to vector<1x32xf32>
    %91 = arith.truncf %86 : vector<8x32xf32> to vector<8x32xbf16>
    %cst_30 = arith.constant dense<0.000000e+00> : vector<8x96xf32>
    %92 = tpu.matmul %91, %87, %cst_30 {dimension_numbers = #tpu.dot_dimension_numbers<[1], [0], [0], [1], [0, 0, 1, 1], [], []>} : vector<8x32xbf16>, vector<32x96xbf16>, vector<8x96xf32> -> vector<8x96xf32>
    %93 = vector.broadcast %89 : vector<1x96xf32> to vector<8x96xf32>
    %94 = arith.addf %92, %93 : vector<8x96xf32>
    %95 = arith.truncf %3 : vector<16x32xf32> to vector<16x32xbf16>
    %cst_31 = arith.constant dense<0.000000e+00> : vector<16x96xf32>
    %96 = tpu.matmul %95, %87, %cst_31 {dimension_numbers = #tpu.dot_dimension_numbers<[1], [0], [0], [1], [0, 0, 1, 1], [], []>} : vector<16x32xbf16>, vector<32x96xbf16>, vector<16x96xf32> -> vector<16x96xf32>
    %97 = vector.broadcast %89 : vector<1x96xf32> to vector<16x96xf32>
    %98 = arith.addf %96, %97 : vector<16x96xf32>
    %99 = vector.extract_strided_slice %94 {offsets = [0, 0], sizes = [8, 8], strides = [1, 1]} : vector<8x96xf32> to vector<8x8xf32>
    %100 = vector.extract_strided_slice %94 {offsets = [0, 8], sizes = [8, 8], strides = [1, 1]} : vector<8x96xf32> to vector<8x8xf32>
    %101 = vector.extract_strided_slice %94 {offsets = [0, 16], sizes = [8, 8], strides = [1, 1]} : vector<8x96xf32> to vector<8x8xf32>
    %102 = vector.extract_strided_slice %94 {offsets = [0, 24], sizes = [8, 8], strides = [1, 1]} : vector<8x96xf32> to vector<8x8xf32>
    %103 = vector.shape_cast %99 : vector<8x8xf32> to vector<1x8x8xf32>
    %104 = vector.shape_cast %100 : vector<8x8xf32> to vector<1x8x8xf32>
    %105 = vector.shape_cast %101 : vector<8x8xf32> to vector<1x8x8xf32>
    %106 = vector.shape_cast %102 : vector<8x8xf32> to vector<1x8x8xf32>
    %107 = tpu.concatenate %103, %104, %105, %106 in 0 : vector<1x8x8xf32>, vector<1x8x8xf32>, vector<1x8x8xf32>, vector<1x8x8xf32> -> vector<4x8x8xf32>
    %cst_32 = arith.constant 0.353553385 : f32
    %108 = vector.broadcast %cst_32 : f32 to vector<4x8x8xf32>
    %109 = arith.mulf %107, %108 : vector<4x8x8xf32>
    %110 = vector.extract_strided_slice %98 {offsets = [0, 32], sizes = [16, 8], strides = [1, 1]} : vector<16x96xf32> to vector<16x8xf32>
    %111 = vector.extract_strided_slice %98 {offsets = [0, 40], sizes = [16, 8], strides = [1, 1]} : vector<16x96xf32> to vector<16x8xf32>
    %112 = vector.extract_strided_slice %98 {offsets = [0, 48], sizes = [16, 8], strides = [1, 1]} : vector<16x96xf32> to vector<16x8xf32>
    %113 = vector.extract_strided_slice %98 {offsets = [0, 56], sizes = [16, 8], strides = [1, 1]} : vector<16x96xf32> to vector<16x8xf32>
    %114 = vector.shape_cast %110 : vector<16x8xf32> to vector<1x16x8xf32>
    %115 = vector.shape_cast %111 : vector<16x8xf32> to vector<1x16x8xf32>
    %116 = vector.shape_cast %112 : vector<16x8xf32> to vector<1x16x8xf32>
    %117 = vector.shape_cast %113 : vector<16x8xf32> to vector<1x16x8xf32>
    %118 = tpu.concatenate %114, %115, %116, %117 in 0 : vector<1x16x8xf32>, vector<1x16x8xf32>, vector<1x16x8xf32>, vector<1x16x8xf32> -> vector<4x16x8xf32>
    %119 = vector.extract_strided_slice %98 {offsets = [0, 64], sizes = [16, 8], strides = [1, 1]} : vector<16x96xf32> to vector<16x8xf32>
    %120 = vector.extract_strided_slice %98 {offsets = [0, 72], sizes = [16, 8], strides = [1, 1]} : vector<16x96xf32> to vector<16x8xf32>
    %121 = vector.extract_strided_slice %98 {offsets = [0, 80], sizes = [16, 8], strides = [1, 1]} : vector<16x96xf32> to vector<16x8xf32>
    %122 = vector.extract_strided_slice %98 {offsets = [0, 88], sizes = [16, 8], strides = [1, 1]} : vector<16x96xf32> to vector<16x8xf32>
    %123 = vector.shape_cast %119 : vector<16x8xf32> to vector<1x16x8xf32>
    %124 = vector.shape_cast %120 : vector<16x8xf32> to vector<1x16x8xf32>
    %125 = vector.shape_cast %121 : vector<16x8xf32> to vector<1x16x8xf32>
    %126 = vector.shape_cast %122 : vector<16x8xf32> to vector<1x16x8xf32>
    %127 = tpu.concatenate %123, %124, %125, %126 in 0 : vector<1x16x8xf32>, vector<1x16x8xf32>, vector<1x16x8xf32>, vector<1x16x8xf32> -> vector<4x16x8xf32>
    %128 = arith.truncf %109 : vector<4x8x8xf32> to vector<4x8x8xbf16>
    %129 = arith.truncf %118 : vector<4x16x8xf32> to vector<4x16x8xbf16>
    "tpu.trace_start"() <{level = 10 : i32, message = "hqd,hkd->hqk"}> : () -> ()
    %cst_33 = arith.constant dense<0.000000e+00> : vector<4x8x16xf32>
    %130 = tpu.matmul %128, %129, %cst_33 {dimension_numbers = #tpu.dot_dimension_numbers<[2], [2], [1], [1], [0, 0, 0, 1, 1, 1], [0], [0]>} : vector<4x8x8xbf16>, vector<4x16x8xbf16>, vector<4x8x16xf32> -> vector<4x8x16xf32>
    "tpu.trace_stop"() : () -> ()
    %cst_34 = arith.constant dense<0xFF800000> : vector<4x8xf32>
    %131 = vector.multi_reduction <maximumf>, %130, %cst_34 [2] : vector<4x8x16xf32> to vector<4x8xf32>
    %132 = vector.shape_cast %131 : vector<4x8xf32> to vector<4x8x1xf32>
    %133 = vector.broadcast %132 : vector<4x8x1xf32> to vector<4x8x16xf32>
    %134 = arith.subf %130, %133 : vector<4x8x16xf32>
    %135 = math.exp %134 : vector<4x8x16xf32>
    %cst_35 = arith.constant dense<0.000000e+00> : vector<4x8xf32>
    %136 = vector.multi_reduction <add>, %135, %cst_35 [2] : vector<4x8x16xf32> to vector<4x8xf32>
    %137 = vector.shape_cast %136 : vector<4x8xf32> to vector<4x8x1xf32>
    %138 = tpu.reciprocal %137 {approx = true} : vector<4x8x1xf32> -> vector<4x8x1xf32>
    %139 = vector.broadcast %138 : vector<4x8x1xf32> to vector<4x8x16xf32>
    %140 = arith.mulf %135, %139 : vector<4x8x16xf32>
    %141 = arith.truncf %140 : vector<4x8x16xf32> to vector<4x8x16xbf16>
    %142 = arith.truncf %127 : vector<4x16x8xf32> to vector<4x16x8xbf16>
    "tpu.trace_start"() <{level = 10 : i32, message = "hqk,hkd->hqd"}> : () -> ()
    %cst_36 = arith.constant dense<0.000000e+00> : vector<4x8x8xf32>
    %143 = tpu.matmul %141, %142, %cst_36 {dimension_numbers = #tpu.dot_dimension_numbers<[2], [1], [1], [2], [0, 0, 0, 1, 1, 2], [0], [0]>} : vector<4x8x16xbf16>, vector<4x16x8xbf16>, vector<4x8x8xf32> -> vector<4x8x8xf32>
    "tpu.trace_stop"() : () -> ()
    %144 = arith.truncf %143 : vector<4x8x8xf32> to vector<4x8x8xbf16>
    %c0_37 = arith.constant 0 : index
    %c0_38 = arith.constant 0 : index
    %c0_39 = arith.constant 0 : index
    %145 = vector.load %arg8[%c0_37, %c0_38, %c0_39] : memref<4x8x32xbf16, #tpu.memory_space<vmem>>, vector<4x8x32xbf16>
    "tpu.trace_start"() <{level = 10 : i32, message = "hqd,hdo->hqo"}> : () -> ()
    %cst_40 = arith.constant dense<0.000000e+00> : vector<4x8x32xf32>
    %146 = tpu.matmul %144, %145, %cst_40 {dimension_numbers = #tpu.dot_dimension_numbers<[2], [1], [1], [2], [0, 0, 0, 1, 1, 2], [0], [0]>} : vector<4x8x8xbf16>, vector<4x8x32xbf16>, vector<4x8x32xf32> -> vector<4x8x32xf32>
    "tpu.trace_stop"() : () -> ()
    %cst_41 = arith.constant dense<0.000000e+00> : vector<8x32xf32>
    %147 = vector.multi_reduction <add>, %146, %cst_41 [0] : vector<4x8x32xf32> to vector<8x32xf32>
    %148 = vector.broadcast %90 : vector<1x32xf32> to vector<8x32xf32>
    %149 = arith.addf %147, %148 : vector<8x32xf32>
    %150 = arith.addf %86, %149 : vector<8x32xf32>
    %cst_42 = arith.constant dense<0.000000e+00> : vector<8xf32>
    %151 = vector.multi_reduction <add>, %150, %cst_42 [1] : vector<8x32xf32> to vector<8xf32>
    %152 = vector.shape_cast %151 : vector<8xf32> to vector<8x1xf32>
    %cst_43 = arith.constant 3.200000e+01 : f32
    %153 = vector.broadcast %cst_43 : f32 to vector<8x1xf32>
    %154 = arith.divf %152, %153 : vector<8x1xf32>
    %155 = vector.broadcast %154 : vector<8x1xf32> to vector<8x32xf32>
    %156 = arith.subf %150, %155 : vector<8x32xf32>
    %157 = arith.mulf %156, %156 : vector<8x32xf32>
    %cst_44 = arith.constant dense<0.000000e+00> : vector<8xf32>
    %158 = vector.multi_reduction <add>, %157, %cst_44 [1] : vector<8x32xf32> to vector<8xf32>
    %159 = vector.shape_cast %158 : vector<8xf32> to vector<8x1xf32>
    %cst_45 = arith.constant 3.200000e+01 : f32
    %160 = vector.broadcast %cst_45 : f32 to vector<8x1xf32>
    %161 = arith.divf %159, %160 : vector<8x1xf32>
    %cst_46 = arith.constant 9.99999974E-6 : f32
    %162 = vector.broadcast %cst_46 : f32 to vector<8x1xf32>
    %163 = arith.addf %161, %162 : vector<8x1xf32>
    %164 = math.rsqrt %163 : vector<8x1xf32>
    %165 = vector.broadcast %164 : vector<8x1xf32> to vector<8x32xf32>
    %166 = arith.mulf %156, %165 : vector<8x32xf32>
    %167 = vector.broadcast %5 : vector<1x32xf32> to vector<8x32xf32>
    %168 = arith.mulf %166, %167 : vector<8x32xf32>
    %169 = vector.broadcast %6 : vector<1x32xf32> to vector<8x32xf32>
    %170 = arith.addf %168, %169 : vector<8x32xf32>
    %c0_47 = arith.constant 0 : index
    %c0_48 = arith.constant 0 : index
    %171 = vector.load %arg12[%c0_47, %c0_48] : memref<1x96xf32, #tpu.memory_space<vmem>>, vector<1x96xf32>
    %172 = vector.extract_strided_slice %171 {offsets = [0, 0], sizes = [1, 64], strides = [1, 1]} : vector<1x96xf32> to vector<1x64xf32>
    %173 = vector.extract_strided_slice %171 {offsets = [0, 64], sizes = [1, 32], strides = [1, 1]} : vector<1x96xf32> to vector<1x32xf32>
    %174 = arith.truncf %170 : vector<8x32xf32> to vector<8x32xbf16>
    %c0_49 = arith.constant 0 : index
    %c0_50 = arith.constant 0 : index
    %175 = vector.load %arg10[%c0_49, %c0_50] : memref<32x64xbf16, #tpu.memory_space<vmem>>, vector<32x64xbf16>
    %cst_51 = arith.constant dense<0.000000e+00> : vector<8x64xf32>
    %176 = tpu.matmul %174, %175, %cst_51 {dimension_numbers = #tpu.dot_dimension_numbers<[1], [0], [0], [1], [0, 0, 1, 1], [], []>} : vector<8x32xbf16>, vector<32x64xbf16>, vector<8x64xf32> -> vector<8x64xf32>
    %177 = vector.broadcast %172 : vector<1x64xf32> to vector<8x64xf32>
    %178 = arith.addf %176, %177 : vector<8x64xf32>
    %cst_52 = arith.constant 0.000000e+00 : f32
    %179 = vector.broadcast %cst_52 : f32 to vector<8x64xf32>
    %180 = arith.maximumf %178, %179 : vector<8x64xf32>
    %181 = arith.truncf %180 : vector<8x64xf32> to vector<8x64xbf16>
    %c0_53 = arith.constant 0 : index
    %c0_54 = arith.constant 0 : index
    %182 = vector.load %arg11[%c0_53, %c0_54] : memref<64x32xbf16, #tpu.memory_space<vmem>>, vector<64x32xbf16>
    %cst_55 = arith.constant dense<0.000000e+00> : vector<8x32xf32>
    %183 = tpu.matmul %181, %182, %cst_55 {dimension_numbers = #tpu.dot_dimension_numbers<[1], [0], [0], [1], [0, 0, 1, 1], [], []>} : vector<8x64xbf16>, vector<64x32xbf16>, vector<8x32xf32> -> vector<8x32xf32>
    %184 = vector.broadcast %173 : vector<1x32xf32> to vector<8x32xf32>
    %185 = arith.addf %183, %184 : vector<8x32xf32>
    %186 = arith.addf %170, %185 : vector<8x32xf32>
    %cst_56 = arith.constant dense<0.000000e+00> : vector<8xf32>
    %187 = vector.multi_reduction <add>, %186, %cst_56 [1] : vector<8x32xf32> to vector<8xf32>
    %188 = vector.shape_cast %187 : vector<8xf32> to vector<8x1xf32>
    %cst_57 = arith.constant 3.200000e+01 : f32
    %189 = vector.broadcast %cst_57 : f32 to vector<8x1xf32>
    %190 = arith.divf %188, %189 : vector<8x1xf32>
    %191 = vector.broadcast %190 : vector<8x1xf32> to vector<8x32xf32>
    %192 = arith.subf %186, %191 : vector<8x32xf32>
    %193 = arith.mulf %192, %192 : vector<8x32xf32>
    %cst_58 = arith.constant dense<0.000000e+00> : vector<8xf32>
    %194 = vector.multi_reduction <add>, %193, %cst_58 [1] : vector<8x32xf32> to vector<8xf32>
    %195 = vector.shape_cast %194 : vector<8xf32> to vector<8x1xf32>
    %cst_59 = arith.constant 3.200000e+01 : f32
    %196 = vector.broadcast %cst_59 : f32 to vector<8x1xf32>
    %197 = arith.divf %195, %196 : vector<8x1xf32>
    %cst_60 = arith.constant 9.99999974E-6 : f32
    %198 = vector.broadcast %cst_60 : f32 to vector<8x1xf32>
    %199 = arith.addf %197, %198 : vector<8x1xf32>
    %200 = math.rsqrt %199 : vector<8x1xf32>
    %201 = vector.broadcast %200 : vector<8x1xf32> to vector<8x32xf32>
    %202 = arith.mulf %192, %201 : vector<8x32xf32>
    %203 = vector.broadcast %5 : vector<1x32xf32> to vector<8x32xf32>
    %204 = arith.mulf %202, %203 : vector<8x32xf32>
    %205 = vector.broadcast %6 : vector<1x32xf32> to vector<8x32xf32>
    %206 = arith.addf %204, %205 : vector<8x32xf32>
    %c0_61 = arith.constant 0 : index
    %c0_62 = arith.constant 0 : index
    %c0_63 = arith.constant 0 : index
    %207 = vector.load %arg13[%c0_61, %c0_62, %c0_63] : memref<1x8x32xf32, #tpu.memory_space<vmem>>, vector<1x8x32xf32>
    %208 = vector.shape_cast %207 : vector<1x8x32xf32> to vector<8x32xf32>
    %209 = vector.shape_cast %206 : vector<8x32xf32> to vector<1x8x32xf32>
    tpu.vector_store %arg13[%c0_61, %c0_62, %c0_63], %209 {strides = array<i32>} : memref<1x8x32xf32, #tpu.memory_space<vmem>>, vector<1x8x32xf32>,
    %c0_64 = arith.constant 0 : index
    %c0_65 = arith.constant 0 : index
    %c0_66 = arith.constant 0 : index
    %c0_67 = arith.constant 0 : index
    %210 = vector.load %arg14[%c0_64, %c0_65, %c0_66, %c0_67] : memref<1x4x8x16xf32, #tpu.memory_space<vmem>>, vector<1x4x8x16xf32>
    %211 = vector.shape_cast %210 : vector<1x4x8x16xf32> to vector<4x8x16xf32>
    %212 = vector.shape_cast %140 : vector<4x8x16xf32> to vector<1x4x8x16xf32>
    tpu.vector_store %arg14[%c0_64, %c0_65, %c0_66, %c0_67], %212 {strides = array<i32>} : memref<1x4x8x16xf32, #tpu.memory_space<vmem>>, vector<1x4x8x16xf32>,
    return
  }
  func.func @transform_0(%arg0: i32) -> (i32, i32, i32) {
    %c0_i32 = arith.constant 0 : i32
    %c0_i32_0 = arith.constant 0 : i32
    %c0_i32_1 = arith.constant 0 : i32
    return %arg0, %c0_i32, %c0_i32_0 : i32, i32, i32
  }
  func.func @transform_1(%arg0: i32) -> (i32, i32, i32) {
    %c0_i32 = arith.constant 0 : i32
    %c0_i32_0 = arith.constant 0 : i32
    %c0_i32_1 = arith.constant 0 : i32
    return %arg0, %c0_i32, %c0_i32_0 : i32, i32, i32
  }
  func.func @transform_2(%arg0: i32) -> (i32, i32) {
    %c0_i32 = arith.constant 0 : i32
    %c0_i32_0 = arith.constant 0 : i32
    %c0_i32_1 = arith.constant 0 : i32
    return %c0_i32, %c0_i32_0 : i32, i32
  }
  func.func @transform_3(%arg0: i32) -> (i32, i32) {
    %c0_i32 = arith.constant 0 : i32
    %c0_i32_0 = arith.constant 0 : i32
    %c0_i32_1 = arith.constant 0 : i32
    return %c0_i32, %c0_i32_0 : i32, i32
  }
  func.func @transform_4(%arg0: i32) -> (i32, i32, i32) {
    %c0_i32 = arith.constant 0 : i32
    %c0_i32_0 = arith.constant 0 : i32
    %c0_i32_1 = arith.constant 0 : i32
    %c0_i32_2 = arith.constant 0 : i32
    return %c0_i32, %c0_i32_0, %c0_i32_1 : i32, i32, i32
  }
  func.func @transform_5(%arg0: i32) -> (i32, i32) {
    %c0_i32 = arith.constant 0 : i32
    %c0_i32_0 = arith.constant 0 : i32
    %c0_i32_1 = arith.constant 0 : i32
    return %c0_i32, %c0_i32_0 : i32, i32
  }
  func.func @transform_6(%arg0: i32) -> (i32, i32) {
    %c0_i32 = arith.constant 0 : i32
    %c0_i32_0 = arith.constant 0 : i32
    %c0_i32_1 = arith.constant 0 : i32
    return %c0_i32, %c0_i32_0 : i32, i32
  }
  func.func @transform_7(%arg0: i32) -> (i32, i32, i32) {
    %c0_i32 = arith.constant 0 : i32
    %c0_i32_0 = arith.constant 0 : i32
    %c0_i32_1 = arith.constant 0 : i32
    %c0_i32_2 = arith.constant 0 : i32
    return %c0_i32, %c0_i32_0, %c0_i32_1 : i32, i32, i32
  }
  func.func @transform_8(%arg0: i32) -> (i32, i32) {
    %c0_i32 = arith.constant 0 : i32
    %c0_i32_0 = arith.constant 0 : i32
    %c0_i32_1 = arith.constant 0 : i32
    return %c0_i32, %c0_i32_0 : i32, i32
  }
  func.func @transform_9(%arg0: i32) -> (i32, i32) {
    %c0_i32 = arith.constant 0 : i32
    %c0_i32_0 = arith.constant 0 : i32
    %c0_i32_1 = arith.constant 0 : i32
    return %c0_i32, %c0_i32_0 : i32, i32
  }
  func.func @transform_10(%arg0: i32) -> (i32, i32) {
    %c0_i32 = arith.constant 0 : i32
    %c0_i32_0 = arith.constant 0 : i32
    %c0_i32_1 = arith.constant 0 : i32
    return %c0_i32, %c0_i32_0 : i32, i32
  }
  func.func @transform_11(%arg0: i32) -> (i32, i32) {
    %c0_i32 = arith.constant 0 : i32
    %c0_i32_0 = arith.constant 0 : i32
    %c0_i32_1 = arith.constant 0 : i32
    return %c0_i32, %c0_i32_0 : i32, i32
  }
  func.func @transform_12(%arg0: i32) -> (i32, i32, i32) {
    %c0_i32 = arith.constant 0 : i32
    %c0_i32_0 = arith.constant 0 : i32
    %c0_i32_1 = arith.constant 0 : i32
    return %arg0, %c0_i32, %c0_i32_0 : i32, i32, i32
  }
  func.func @transform_13(%arg0: i32) -> (i32, i32, i32, i32) {
    %c0_i32 = arith.constant 0 : i32
    %c0_i32_0 = arith.constant 0 : i32
    %c0_i32_1 = arith.constant 0 : i32
    %c0_i32_2 = arith.constant 0 : i32
    return %arg0, %c0_i32, %c0_i32_0, %c0_i32_1 : i32, i32, i32, i32
  }
}

</mosaic_0001>

<bundles_post_ra>
// kernel: tpu_custom_call.1
= control target key start
LH: loop header
LB: loop body
LE: loop exit
PB: predicated region body
PF: predicated region fallthrough
CT: control target
= control target key end

     0   :  { %s2809_s0 = inlined_call_operand.vmem [shape: f32[2,8,32], index: 0, kind: input, shape index: {}]   ;;  %s2810_s1 = inlined_call_operand.vmem [shape: f32[2,16,32], index: 1, kind: input, shape index: {}]   ;;  %s2811_s2 = inlined_call_operand.hbm [shape: f32[2,32], index: 2, kind: input, shape index: {}]   ;;  %s2812_s3 = inlined_call_operand.hbm [shape: bf16[32,96], index: 3, kind: input, shape index: {}]   ;;  %s2813_s4 = inlined_call_operand.hbm [shape: bf16[4,8,32], index: 4, kind: input, shape index: {}]   ;;  %s2814_s5 = inlined_call_operand.vmem [shape: f32[1,128], index: 5, kind: input, shape index: {}]   ;;  %s2815_s6 = inlined_call_operand.hbm [shape: bf16[32,96], index: 6, kind: input, shape index: {}]   ;;  %s2816_s7 = inlined_call_operand.hbm [shape: bf16[4,8,32], index: 7, kind: input, shape index: {}]   ;;  %s2817_s8 = inlined_call_operand.vmem [shape: f32[1,128], index: 8, kind: input, shape index: {}]   ;;  %s2818_s9 = inlined_call_operand.hbm [shape: bf16[32,64], index: 9, kind: input, shape index: {}]   ;;  %s2819_s10 = inlined_call_operand.vmem [shape: bf16[64,32], index: 10, kind: input, shape index: {}]   ;;  %s2820_s11 = inlined_call_operand.vmem [shape: f32[1,96], index: 11, kind: input, shape index: {}]   ;;  %s2821_s12 = inlined_call_operand.hbm [shape: f32[2,8,32], index: 12, kind: output, shape index: {0}]   ;;  %s2822_s13 = inlined_call_operand.hbm [shape: f32[2,4,8,16], index: 13, kind: output, shape index: {1}]  }
   0x1   :  { %2829 = sst [smem:[#allocation28_spill]] %s2811_s2 }
   0x2   :  { %2830 = sst [smem:[#allocation29_spill]] %s2812_s3 }
   0x3   :  { %2831 = sst [smem:[#allocation30_spill]] %s2815_s6 }
   0x4   :  { %19 = vsyncpa [#allocation3], 0 }
   0x5   :  { %20 = vsyncpa [#allocation6], 0 }
   0x6   :  { %21 = vsyncpa [#allocation9], 0 }
   0x7   :  { %22 = vsyncpa [#allocation12], 0 }
   0x8   :  { %23 = vsyncpa [#allocation4], 0 }
   0x9   :  { %25 = vsyncpa [#allocation4 + $0x1], 0 }
   0xa   :  { %26 = vsyncpa [#allocation15], 0 }
   0xb   :  { %28 = vsyncpa [#allocation15 + $0x1], 0  ;;  %s2424_s25 = smov 0   ;;  %s2426_s26 = smov 0  }
   0xc   :  { %s2428_s27 = smov 0   ;;  %s2430_s28 = smov 0  }
   0xd LB: > { %2832 = sst [smem:[#allocation22_spill]] %s2323_s25  ;;  %s2445_s29 = sadd.s32 4294967295, %s2335_s28   ;;  %s2335_s28 = sphi %s2430_s28, %s2848_s28   ;;  %s2331_s27 = sphi %s2428_s27, %s2850_s27   ;;  %s2327_s26 = sphi %s2426_s26, %s2852_s26   ;;  %s2323_s25 = sphi %s2424_s25, %s2851_s25  }
   0xe   : > { %2833 = sst [smem:[#allocation23_spill]] %s2331_s27  ;;  %s1762_s30 = sadd.s32 4294967294, %s2335_s28  }
   0xf   : > { %2834 = sst [smem:[#allocation24_spill]] %s2335_s28  ;;  %s2449_s14 = sadd.s32 1, %s2335_s28  }
  0x10   : > { %2835 = sst [smem:[#allocation25_spill]] %s2449_s14  ;;  %s303_s15 = sadd.s32 1, %s2331_s27 }
  0x11   : > { %s300_s16 = ssub.s32 %s2335_s28, %s2449_s14  ;;  %p313_p0 = scmp.ne.s32.totalorder %s2331_s27, %s2327_s26 }
  0x12   : > { %p301_p1 = scmp.eq.s32.totalorder %s300_s16, 0  ;;  %p314_p2 = scmp.eq.s32.totalorder %s2445_s29, 1 }
  0x13   : > { %p319_p3 = scmp.ne.s32.totalorder %s2327_s26, %s2323_s25  ;;  %p320_p4 = scmp.eq.s32.totalorder %s1762_s30, 1 }
  0x14   : > { %s2460_s17 = scalar_select %p301_p1, %s2331_s27, %s303_s15  }
  0x15   : > { %p2462_p5 = por %p314_p2, %p313_p0  ;;  %p2466_p6 = por %p320_p4, %p319_p3 }
  0x16   : > { %2836 = sst [smem:[#allocation26_spill]] %s2460_s17  ;;  %p1763_p7 = scmp.ge.s32.totalorder %s2335_s28, 1 }
  0x17   : > { %s2838_s19 = scalar_select %p2466_p6, 1, 0 }
  0x18   : > { %p353_p8 = scmp.lt.s32.totalorder %s2335_s28, 3  ;;  %p1925_p9 = scmp.eq.s32.totalorder %s2445_s29, 0 }
  0x19   : > { %2839 = sst [smem:[#allocation27_spill]] %s2838_s19  ;;  %s2337_s24 = smov [#allocation5]  }
  0x1a   : > { %p2473_p10 = pnand %p1763_p7, %p353_p8  ;;  %s2841_s3 = sld [smem:[#allocation29_spill]] }
  0x1b   : > { %s378_s30 = sshll.u32 %s2337_s24, 4  ;;  %s2843_s6 = sld [smem:[#allocation30_spill]]  ;;  %s379_s30 = int_to_ptr.vmem [resolvable:$true] %s378_s30 }
  0x1c   : > { %p1899_p11 = pneg %p2473_p10  ;;  %s2338_s21 = smov 64  }
  0x1d   : > { %s2339_s22 = smov 4   ;;  %s2340_s24 = smov [#allocation8]  }
  0x1e   : > { %p2484_p12 = pnand %p1925_p9, %p1899_p11  ;;  %s2844_s2 = sld [smem:[#allocation28_spill]] }
  0x1f   : > { %s2341_s28 = smov [#allocation2]   ;;  %s2342_s14 = smov [#allocation7]  }
  0x20   : > { %s376_s23 = sshll.u32 %s2841_s3, 4  ;;  %s409_s3 = sshll.u32 %s2340_s24, 4  ;;  %s377_s23 = int_to_ptr.hbm [resolvable:$true] %s376_s23  ;;  %s410_s3 = int_to_ptr.vmem [resolvable:$true] %s409_s3 }
  0x21   : > { %s407_s27 = sshll.u32 %s2843_s6, 4  ;;  %s390_s6 = sshll.u32 %s2813_s4, 4  ;;  %s408_s27 = int_to_ptr.hbm [resolvable:$true] %s407_s27  ;;  %s391_s6 = int_to_ptr.hbm [resolvable:$true] %s390_s6 }
  0x22   : > { %1905 = dma.hbm_to_vmem [thread:$0]  (!%p2484_p12), %s377_s23, 256, %s379_s30, [#allocation6], %s2338_s21, %s2338_s21, %s2339_s22  }
  0x23   : > { %1911 = dma.hbm_to_vmem [thread:$0]  (!%p2484_p12), %s408_s27, 256, %s410_s3, [#allocation9], %s2338_s21, %s2338_s21, %s2339_s22  }
  0x24   : > { %s365_s25 = sshll.u32 %s2844_s2, 4  ;;  %s367_s23 = sshll.u32 %s2341_s28, 4  ;;  %s366_s25 = int_to_ptr.hbm [resolvable:$true] %s365_s25  ;;  %s368_s23 = int_to_ptr.vmem [resolvable:$true] %s367_s23 }
  0x25   : > { %1902 = dma.hbm_to_vmem [thread:$0]  (!%p2484_p12), %s366_s25, 32, %s368_s23, [#allocation3]  }
  0x26   : > { %s392_s19 = sshll.u32 %s2342_s14, 4  ;;  %s421_s2 = sshll.u32 %s2816_s7, 4  ;;  %s393_s19 = int_to_ptr.vmem [resolvable:$true] %s392_s19  ;;  %s422_s2 = int_to_ptr.hbm [resolvable:$true] %s421_s2 }
  0x27   : > { %1908 = dma.hbm_to_vmem [thread:$0]  (!%p2484_p12), %s391_s6, 256, %s393_s19, [#allocation6], %s2338_s21, %s2338_s21, %s2339_s22  }
  0x28   : > { %s438_s28 = sshll.u32 %s2818_s9, 4  ;;  %s2343_s17 = smov [#allocation10]   ;;  %s439_s28 = int_to_ptr.hbm [resolvable:$true] %s438_s28 }
  0x29   : > { %s423_s25 = sshll.u32 %s2343_s17, 4  ;;  %s2344_s16 = smov [#allocation11]   ;;  %s424_s25 = int_to_ptr.vmem [resolvable:$true] %s423_s25 }
  0x2a   : > { %1914 = dma.hbm_to_vmem [thread:$0]  (!%p2484_p12), %s422_s2, 256, %s424_s25, [#allocation9], %s2338_s21, %s2338_s21, %s2339_s22  }
  0x2b   : > { %s440_s23 = sshll.u32 %s2344_s16, 4  ;;  %477 = sbr.rel (%p2473_p10) target bundleno = 3113 (0xc29), region = 68  ;;  %s441_s23 = int_to_ptr.vmem [resolvable:$true] %s440_s23 }
  0x2c   : > { %1917 = dma.hbm_to_vmem [thread:$0]  (!%p2484_p12), %s439_s28, 256, %s441_s23, [#allocation12], %s2338_s21, %s2338_s21, %s2339_s22  }
  0x30   : > { %2298 = dma.done.wait (%p1925_p9), [#allocation3], 32  }
  0x31   : > { %2300 = vsyncadd (%p1925_p9), [#allocation3], 4294967264 }
  0x32   : > { %2302 = dma.done.wait (%p1925_p9), [#allocation6], 512  }
  0x33   : > { %2304 = vsyncadd (%p1925_p9), [#allocation6], 4294966784 }
  0x34   : > { %2306 = dma.done.wait (%p1925_p9), [#allocation9], 512  }
  0x35   : > { %2308 = vsyncadd (%p1925_p9), [#allocation9], 4294966784 }
  0x36   : > { %2310 = dma.done.wait (%p1925_p9), [#allocation12], 256  }
  0x37   : > { %2312 = vsyncadd (%p1925_p9), [#allocation12], 4294967040  ;;  %p556_p13 = scmp.lt.s32.totalorder %s2445_s29, 1  ;;  %v1861_v0 = vld [vmem:[#allocation5 + $0x8] sm:$0xff]  ;;  %v1860_v1 = vld [vmem:[#allocation5] sm:$0xff]  ;;  %vm591_vm0 = vcmask 261120  }
  0x38   : > { %601 = vmatpush.bf16.msra.mxu0 %v1861_v0  ;;  %v2564_v4 = vld [vmem:[%s2814_s5] ss:$0 sm:$0xff]  ;;  %s2345_s19 = smov 104   ;;  %s2346_s30 = smov 120   ;;  %vm635_vm1 = vcmask 64512   ;;  %vm780_vm2 = vcmask 1043456  }
  0x39   : > { %s2550_s2 = scalar_select %p556_p13, %s2445_s29, 1  ;;  %vm1194_vm7 = vcmask 130048   ;;  %vm1513_vm11 = vcmask 523264  }
  0x3a   : > { %s2347_s24 = smov 112   ;;  %s2348_s3 = smov 96  }
  0x3b   : > { %s1780_s6 = sshll.u32 %s2550_s2, 3  ;;  %s2349_s27 = smov 64  }
  0x3c   : > { %s559_s21 = scalar_lea.vmem %s2809_s0, %s1780_s6  ;;  %602 = vmatpush.bf16.msra.mxu0 %v1860_v1  ;;  %s2350_s28 = smov 32  }
  0x3d   : > { %v2556_v2 = vld [vmem:[%s559_s21] sm:$0xff]  ;;  %s1859_s17 = sshll.u32 %s2550_s2, 4  ;;  %s2696_s20 = sand.u32 1, %s2327_s26  }
  0x3e   : > { %v575_v3 = vpack.c.bf16 %v2556_v2, %v2556_v2  ;;  %s564_s23 = scalar_lea.vmem %s2810_s1, %s1859_s17  ;;  %s1779_s15 = sshll.u32 %s2696_s20, 5 }
  0x3f   : > { %s2699_s21 = scalar_lea.vmem [#allocation14], %s1779_s15  ;;  %s1870_s16 = sshll.u32 %s2445_s29, 5 }
  0x40   : > { %1791 = vmatmul.msk.bf16.vlgmr.msra.gmra.mxu0 %vm591_vm0, %v575_v3  ;;  %s1591_s6 = scalar_lea.hbm %s2822_s13, %s1870_s16  ;;  %s1592_s15 = sshll.u32 %s2699_s21, 4  ;;  %s1593_s15 = int_to_ptr.vmem [resolvable:$true] %s1592_s15 }
  0x41   : > { %s1594_s22 = sshll.u32 %s1591_s6, 4  ;;  %s1566_s14 = scalar_lea.sflag [#allocation15], %s2696_s20  ;;  %s1595_s22 = int_to_ptr.hbm [resolvable:$true] %s1594_s22 }
  0xbd   : > { %v604_v5 = vpop.f32.mrf.mxu0 }
  0xbe   : > { %v605_v6 = vadd.f32 %v2564_v4, %v604_v5 }
  0xc0   : > { %615 = vrot.lane.b32.xlu1 %v605_v6, %s2345_s19  ;;  %609 = vrot.lane.b32.xlu0 %v605_v6, %s2346_s30  ;;  %v626_v20 = vpack.c.bf16 %v605_v6, %v605_v6  ;;  %v618_v29 = vmul.f32 0.35355338, %v605_v6 }
  0xc2   : > { %v631_v21 = vunpack.c.l.b16 %v626_v20  ;;  %v622_v30 = vpack.c.bf16 %v618_v29, %v618_v29 }
  0xc4   : > { %v632_v22 = vpack.c.b16 %v631_v21, %v631_v21 }
  0xc5   : > { %v606_v7 = vpop.f32.mrf.mxu0 }
  0xc8   : > { %612 = vrot.lane.b32.xlu0 %v605_v6, %s2347_s24 }
 0x132   : > { %v616_v8 = vpop.permute.xlu1 %615  ;;  %v610_v9 = vpop.permute.xlu0 %609 }
 0x133   : > { %v629_v10 = vpack.c.bf16 %v616_v8, %v616_v8  ;;  %v627_v11 = vpack.c.bf16 %v610_v9, %v610_v9  ;;  %v621_v35 = vmul.f32 0.35355338, %v616_v8  ;;  %v619_v36 = vmul.f32 0.35355338, %v610_v9 }
 0x135   : > { %v704_v12 = vunpack.c.l.b16 %v629_v10  ;;  %v656_v13 = vunpack.c.l.b16 %v627_v11  ;;  %v625_v37 = vpack.c.bf16 %v621_v35, %v621_v35  ;;  %v623_v38 = vpack.c.bf16 %v619_v36, %v619_v36  ;;  %v867_v35 = vld [vmem:[#allocation7 + $0xc] sm:$0xf] }
 0x136   : > { %v929_v36 = vsel %vm780_vm2, %v867_v35, 0 }
 0x137   : > { %v2570_v14 = vpack.c.b16 %v704_v12, %v704_v12  ;;  %v657_v15 = vpack.c.b16 %v656_v13, %v656_v13 }
 0x139   : > { %706 = vrot.lane.b32.xlu0 %v2570_v14, %s2348_s3  ;;  %658 = vrot.lane.b32.xlu1 %v657_v15, %s2348_s3 }
 0x13a   : > { %v613_v16 = vpop.permute.xlu0 %612 }
 0x13b   : > { %v628_v17 = vpack.c.bf16 %v613_v16, %v613_v16  ;;  %v620_v25 = vmul.f32 0.35355338, %v613_v16 }
 0x13d   : > { %v680_v18 = vunpack.c.l.b16 %v628_v17  ;;  %v624_v26 = vpack.c.bf16 %v620_v25, %v620_v25 }
 0x13f   : > { %v2575_v19 = vpack.c.b16 %v680_v18, %v680_v18 }
 0x141   : > { %682 = vrot.lane.b32.xlu2 %v2575_v19, %s2348_s3 }
 0x149   : > { %633 = vrot.lane.b32.xlu2 %v632_v22, %s2348_s3 }
 0x19b   : > { %v683_v23 = vpop.permute.xlu2 %682 }
 0x19c   : > { %v688_v24 = vsel %vm635_vm1, %v683_v23, 0 }
 0x19d   : > { %697 = vmatpush.bf16.xpose.msra.mxu3 %v688_v24 }
 0x1a3   : > { %v634_v27 = vpop.permute.xlu2 %633 }
 0x1a4   : > { %1794 = vmatmul.msk.bf16.vlgmr.msra.gmra.mxu3 %vm635_vm1, %v624_v26  ;;  %v640_v28 = vsel %vm635_vm1, %v634_v27, 0 }
 0x1a5   : > { %649 = vmatpush.bf16.xpose.msra.mxu1 %v640_v28 }
 0x1ab   : > { %v659_v31 = vpop.permute.xlu1 %658  ;;  %v707_v32 = vpop.permute.xlu0 %706 }
 0x1ac   : > { %1792 = vmatmul.msk.bf16.vlgmr.msra.gmra.mxu1 %vm635_vm1, %v622_v30  ;;  %v664_v33 = vsel %vm635_vm1, %v659_v31, 0  ;;  %v712_v34 = vsel %vm635_vm1, %v707_v32, 0 }
 0x1ad   : > { %673 = vmatpush.bf16.xpose.msra.mxu2 %v664_v33  ;;  %721 = vmatpush.bf16.xpose.msrb.mxu0 %v712_v34  ;;  %v864_v33 = vld [vmem:[#allocation7] sm:$0xf] }
 0x1ae   : > { %v872_v34 = vsel %vm780_vm2, %v864_v33, 0 }
 0x1b4   : > { %1793 = vmatmul.msk.bf16.vlgmr.msra.gmra.mxu2 %vm635_vm1, %v623_v38  ;;  %1795 = vmatmul.msk.bf16.vlgmr.msrb.gmra.mxu0 %vm635_vm1, %v625_v37  ;;  %v865_v37 = vld [vmem:[#allocation7 + $0x4] sm:$0xf] }
 0x1b5   : > { %v891_v38 = vsel %vm780_vm2, %v865_v37, 0 }
 0x227   : > { %v699_v39 = vpop.f32.mrf.mxu3 }
 0x228   : > { %v733_v40 = vsel %vm635_vm1, %v699_v39, -inf }
 0x229   : > { %734 = vmax.xlane.f32.xlu2 %v733_v40  ;;  %v651_v41 = vpop.f32.mrf.mxu1 }
 0x22a   : > { %v727_v42 = vsel %vm635_vm1, %v651_v41, -inf }
 0x22b   : > { %728 = vmax.xlane.f32.xlu0 %v727_v42 }
 0x22f   : > { %v701_v43 = vpop.f32.mrf.mxu3 }
 0x231   : > { %v653_v44 = vpop.f32.mrf.mxu1  ;;  %v723_v45 = vpop.f32.mrf.mxu0 }
 0x232   : > { %v736_v46 = vsel %vm635_vm1, %v723_v45, -inf }
 0x233   : > { %737 = vmax.xlane.f32.xlu2 %v736_v46 }
 0x237   : > { %v675_v47 = vpop.f32.mrf.mxu2 }
 0x238   : > { %v730_v48 = vsel %vm635_vm1, %v675_v47, -inf }
 0x239   : > { %731 = vmax.xlane.f32.xlu1 %v730_v48  ;;  %v725_v49 = vpop.f32.mrf.mxu0 }
 0x23f   : > { %v677_v50 = vpop.f32.mrf.mxu2  ;;  %797 = vrot.lane.b32.xlu0 %v657_v15, %s2349_s27 }
 0x247   : > { %775 = vrot.lane.b32.xlu0 %v632_v22, %s2349_s27 }
 0x29c   : > { %v735_v51 = vpop.xlane.xlu2 %734 }
 0x29d   : > { %v741_v57 = vsub.f32 %v699_v39, %v735_v51 }
 0x29e   : > { %v729_v52 = vpop.xlane.xlu0 %728 }
 0x29f   : > { %v739_v53 = vsub.f32 %v651_v41, %v729_v52  ;;  %v747_v61 = vmul.f32 1.442695, %v741_v57  ;;  %v866_v41 = vld [vmem:[#allocation7 + $0x8] sm:$0xf] }
 0x2a0   : > { %v910_v42 = vsel %vm780_vm2, %v866_v41, 0 }
 0x2a1   : > { %v743_v54 = vmul.f32 1.442695, %v739_v53 }
 0x2a3   : > { %2005 = vpow2.f32 %v743_v54 }
 0x2a6   : > { %v738_v55 = vpop.xlane.xlu2 %737 }
 0x2a7   : > { %v742_v56 = vsub.f32 %v723_v45, %v738_v55 }
 0x2a9   : > { %v2006_v58 = vpop.eup %2005  ;;  %v749_v59 = vmul.f32 1.442695, %v742_v56 }
 0x2aa   : > { %v751_v60 = vsel %vm635_vm1, %v2006_v58, 0.0 }
 0x2ab   : > { %2007 = vpow2.f32 %v749_v59  ;;  %752 = vadd.xlane.f32.xlu2 %v751_v60 }
 0x2ac   : > { %v732_v62 = vpop.xlane.xlu1 %731  ;;  %2009 = vpow2.f32 %v747_v61 }
 0x2ad   : > { %v740_v63 = vsub.f32 %v675_v47, %v732_v62 }
 0x2af   : > { %v745_v0 = vmul.f32 1.442695, %v740_v63 }
 0x2b1   : > { %v2008_v1 = vpop.eup %2007  ;;  %2011 = vpow2.f32 %v745_v0  ;;  %v798_v3 = vpop.permute.xlu0 %797 }
 0x2b2   : > { %v760_v5 = vsel %vm635_vm1, %v2008_v1, 0.0  ;;  %v803_v6 = vsel %vm780_vm2, %v798_v3, 0  ;;  %v2010_v7 = vpop.eup %2009 }
 0x2b3   : > { %761 = vadd.xlane.f32.xlu2 %v760_v5  ;;  %812 = vmatpush.bf16.msrb.mxu2 %v803_v6  ;;  %v757_v11 = vsel %vm635_vm1, %v2010_v7, 0.0 }
 0x2b7   : > { %v2012_v8 = vpop.eup %2011  ;;  %900 = vmatpush.bf16.msra.mxu2 %v891_v38 }
 0x2b8   : > { %v754_v9 = vsel %vm635_vm1, %v2012_v8, 0.0 }
 0x2b9   : > { %755 = vadd.xlane.f32.xlu1 %v754_v9  ;;  %v776_v10 = vpop.permute.xlu0 %775  ;;  %v1863_v9 = vld [vmem:[#allocation8 + $0x8] sm:$0xff] }
 0x2ba   : > { %v782_v12 = vsel %vm780_vm2, %v776_v10, 0  ;;  %v2351_v10 = vmov 32.0  }
 0x2bb   : > { %758 = vadd.xlane.f32.xlu2 %v757_v11  ;;  %791 = vmatpush.bf16.msrb.mxu1 %v782_v12  ;;  %v567_v11 = vld [vmem:[%s564_s23] sm:$0xff]  ;;  %v568_v12 = vld [vmem:[%s564_s23 + $0x8] sm:$0xff] }
 0x2bf   : > { %881 = vmatpush.bf16.msra.mxu1 %v872_v34 }
 0x2d2   : > { %818 = vrot.lane.b32.xlu1 %v2575_v19, %s2349_s27 }
 0x2d3   : > { %839 = vrot.lane.b32.xlu2 %v2570_v14, %s2349_s27 }
 0x2da   : > { %951 = vrot.lane.b32.xlu1 %v2564_v4, %s2350_s28 }
 0x31e   : > { %v753_v13 = vpop.xlane.xlu2 %752 }
 0x31f   : > { %2013 = vrcp.f32 %v753_v13  ;;  %v1862_v13 = vld [vmem:[#allocation8] sm:$0xff] }
 0x325   : > { %v2014_v15 = vpop.eup %2013 }
 0x326   : > { %v767_v16 = vmul.f32 %v2014_v15, %v2006_v58  ;;  %v762_v17 = vpop.xlane.xlu2 %761  ;;  %v1026_v15 = vpack.c.bf16 %v568_v12, %v567_v11 }
 0x327   : > { %2015 = vrcp.f32 %v762_v17 }
 0x328   : > { %v771_v18 = vpack.c.bf16 %v767_v16, %v767_v16 }
 0x32a   : > { %1796 = vmatmul.msk.bf16.vlgmr.msrb.gmra.mxu1 %vm635_vm1, %v771_v18 }
 0x32b   : > { %1019 = vmatpush.bf16.msrb.mxu1 %v1863_v9 }
 0x32c   : > { %v756_v20 = vpop.xlane.xlu1 %755 }
 0x32d   : > { %2017 = vrcp.f32 %v756_v20  ;;  %v2016_v22 = vpop.eup %2015 }
 0x32e   : > { %v759_v21 = vpop.xlane.xlu2 %758  ;;  %v770_v25 = vmul.f32 %v2016_v22, %v2008_v1 }
 0x32f   : > { %2019 = vrcp.f32 %v759_v21  ;;  %1020 = vmatpush.bf16.msrb.mxu1 %v1862_v13 }
 0x330   : > { %v774_v27 = vpack.c.bf16 %v770_v25, %v770_v25  ;;  %2021 = vrcp.f32 %v2351_v10 }
 0x333   : > { %v2018_v23 = vpop.eup %2017 }
 0x334   : > { %v768_v24 = vmul.f32 %v2018_v23, %v2012_v8 }
 0x335   : > { %v2020_v28 = vpop.eup %2019 }
 0x336   : > { %v840_v19 = vpop.permute.xlu2 %839  ;;  %v772_v26 = vpack.c.bf16 %v768_v24, %v768_v24  ;;  %v769_v29 = vmul.f32 %v2020_v28, %v2010_v7 }
 0x337   : > { %v845_v14 = vsel %vm780_vm2, %v840_v19, 0 }
 0x338   : > { %1797 = vmatmul.msk.bf16.vlgmr.msrb.gmra.mxu2 %vm635_vm1, %v772_v26  ;;  %854 = vmatpush.bf16.msra.mxu0 %v845_v14  ;;  %v773_v32 = vpack.c.bf16 %v769_v29, %v769_v29  ;;  %v2638_v14 = vld [vmem:[%s2817_s8] ss:$0 sm:$0xff] }
 0x339   : > { %1036 = vmatpush.bf16.msrb.mxu2 %v1863_v9 }
 0x33b   : > { %1799 = vmatmul.msk.bf16.vlgmr.msra.gmra.mxu0 %vm635_vm1, %v774_v27 }
 0x33c   : > { %938 = vmatpush.bf16.msrb.mxu0 %v929_v36 }
 0x33d   : > { %1037 = vmatpush.bf16.msrb.mxu2 %v1862_v13 }
 0x344   : > { %v819_v30 = vpop.permute.xlu1 %818 }
 0x345   : > { %v824_v31 = vsel %vm780_vm2, %v819_v30, 0 }
 0x346   : > { %833 = vmatpush.bf16.msrb.mxu3 %v824_v31 }
 0x349   : > { %1798 = vmatmul.msk.bf16.vlgmr.msrb.gmra.mxu3 %vm635_vm1, %v773_v32 }
 0x34a   : > { %919 = vmatpush.bf16.msra.mxu3 %v910_v42 }
 0x34c   : > { %v952_v1 = vpop.permute.xlu1 %951 }
 0x3a7   : > { %v793_v39 = vpop.f32.mrf.mxu1 }
 0x3a8   : > { %v860_v40 = vpack.c.bf16 %v793_v39, %v793_v39 }
 0x3aa   : > { %1800 = vmatmul.msk.bf16.vlgmr.msra.gmra.mxu1 %vm635_vm1, %v860_v40 }
 0x3af   : > { %v795_v4 = vpop.f32.mrf.mxu1 }
 0x3b0   : > { %v569_v4 = vld [vmem:[#allocation2] sm:$0x3] }
 0x3b8   : > { %v856_v43 = vpop.f32.mrf.mxu0 }
 0x3b9   : > { %v863_v44 = vpack.c.bf16 %v856_v43, %v856_v43 }
 0x3bb   : > { %v814_v45 = vpop.f32.mrf.mxu2  ;;  %1803 = vmatmul.msk.bf16.vlgmr.msrb.gmra.mxu0 %vm635_vm1, %v863_v44 }
 0x3bc   : > { %v861_v46 = vpack.c.bf16 %v814_v45, %v814_v45  ;;  %v2650_v45 = vperm.slane %v569_v4, 0 }
 0x3be   : > { %1801 = vmatmul.msk.bf16.vlgmr.msra.gmra.mxu2 %vm635_vm1, %v861_v46 }
 0x3c0   : > { %v858_v47 = vpop.f32.mrf.mxu0 }
 0x3c1   : > { %v2652_v47 = vperm.slane %v569_v4, 1 }
 0x3c3   : > { %v816_v48 = vpop.f32.mrf.mxu2 }
 0x3cc   : > { %v835_v49 = vpop.f32.mrf.mxu3 }
 0x3cd   : > { %v862_v50 = vpack.c.bf16 %v835_v49, %v835_v49 }
 0x3ce   : > { %1813 = vmatmul.msk.bf16.vlgmr.msrb.gmra.mxu2 %vm591_vm0, %v1026_v15 }
 0x3cf   : > { %1802 = vmatmul.msk.bf16.vlgmr.msra.gmra.mxu3 %vm635_vm1, %v862_v50 }
 0x3d4   : > { %v837_v51 = vpop.f32.mrf.mxu3 }
 0x427   : > { %v883_v52 = vpop.f32.mrf.mxu1 }
 0x428   : > { %v944_v59 = vsel %vm591_vm0, %v883_v52, 0.0 }
 0x42f   : > { %v885_v53 = vpop.f32.mrf.mxu1 }
 0x438   : > { %v940_v54 = vpop.f32.mrf.mxu0 }
 0x439   : > { %v949_v0 = vsel %vm591_vm0, %v940_v54, 0.0 }
 0x440   : > { %v942_v55 = vpop.f32.mrf.mxu0 }
 0x441   : > { %v902_v56 = vpop.f32.mrf.mxu2 }
 0x442   : > { %v945_v58 = vsel %vm591_vm0, %v902_v56, 0.0 }
 0x443   : > { %v946_v60 = vadd.f32 %v945_v58, %v944_v59 }
 0x449   : > { %v904_v57 = vpop.f32.mrf.mxu2 }
 0x451   : > { %v1039_v26 = vpop.f32.mrf.mxu2 }
 0x452   : > { %v921_v61 = vpop.f32.mrf.mxu3  ;;  %v1040_v27 = vadd.f32 %v2638_v14, %v1039_v26 }
 0x453   : > { %v947_v62 = vsel %vm591_vm0, %v921_v61, 0.0 }
 0x454   : > { %v948_v63 = vadd.f32 %v947_v62, %v946_v60  ;;  %v1082_v29 = vpack.c.bf16 %v1040_v27, %v1040_v27 }
 0x456   : > { %v950_v3 = vadd.f32 %v949_v0, %v948_v63  ;;  %v1092_v35 = vunpack.c.l.b16 %v1082_v29 }
 0x458   : > { %v954_v5 = vadd.f32 %v952_v1, %v950_v3 }
 0x459   : > { %v1041_v28 = vpop.f32.mrf.mxu2 }
 0x45a   : > { %v923_v6 = vpop.f32.mrf.mxu3  ;;  %v955_v7 = vadd.f32 %v954_v5, %v2556_v2  ;;  %v2022_v2 = vpop.eup %2021  ;;  %v1042_v31 = vadd.f32 %v2638_v14, %v1041_v28 }
 0x45b   : > { %v960_v16 = vmul.f32 32.0, %v2022_v2  ;;  %vm964_vm3 = vweird.f32 %v2022_v2 }
 0x45c   : > { %v956_v8 = vsel %vm591_vm0, %v955_v7, 0.0  ;;  %v1987_v33 = vpack.i.bf16 %v1042_v31, %v1040_v27  ;;  %v1083_v34 = vpack.c.bf16 %v1042_v31, %v1042_v31 }
 0x45d   : > { %957 = vadd.xlane.f32.xlu0 %v956_v8  ;;  %v961_v17 = vsub.f32 1.0, %v960_v16 }
 0x45e   : > { %1988 = vrot.lane.b32.xlu2 %v1987_v33, %s2345_s19  ;;  %v1093_v37 = vunpack.c.l.b16 %v1083_v34 }
 0x45f   : > { %v962_v18 = vmul.f32 %v2022_v2, %v961_v17 }
 0x460   : > { %v2644_v38 = vpack.c.b16 %v1093_v37, %v1092_v35 }
 0x461   : > { %v963_v20 = vadd.f32 %v2022_v2, %v962_v18 }
 0x463   : > { %v2631_v21 = vsel %vm964_vm3, %v2022_v2, %v963_v20 }
 0x466   : > { %1993 = vrot.lane.b32.xlu2 %v1987_v33, %s2346_s30 }
 0x46e   : > { %1998 = vrot.lane.b32.xlu2 %v1987_v33, %s2347_s24 }
 0x471   : > { %1095 = vrot.lane.b32.xlu0 %v2644_v38, %s2348_s3 }
 0x4b8   : > { %v1989_v52 = vpop.permute.xlu2 %1988 }
 0x4b9   : > { %v1991_v53 = vunpack.i.h.bf16 %v1989_v52  ;;  %v1990_v54 = vunpack.i.l.bf16 %v1989_v52 }
 0x4bb   : > { %v1089_v55 = vpack.c.bf16 %v1991_v53, %v1991_v53  ;;  %v1088_v56 = vpack.c.bf16 %v1990_v54, %v1990_v54 }
 0x4bd   : > { %v1171_v57 = vunpack.c.l.b16 %v1089_v55  ;;  %v1170_v58 = vunpack.c.l.b16 %v1088_v56 }
 0x4bf   : > { %v2661_v59 = vpack.c.b16 %v1171_v57, %v1170_v58 }
 0x4c0   : > { %v1994_v60 = vpop.permute.xlu2 %1993 }
 0x4c1   : > { %v1996_v61 = vunpack.i.h.bf16 %v1994_v60  ;;  %v1995_v62 = vunpack.i.l.bf16 %v1994_v60  ;;  %1173 = vrot.lane.b32.xlu2 %v2661_v59, %s2348_s3 }
 0x4c3   : > { %v1085_v63 = vpack.c.bf16 %v1996_v61, %v1996_v61  ;;  %v1084_v0 = vpack.c.bf16 %v1995_v62, %v1995_v62 }
 0x4c5   : > { %v1119_v1 = vunpack.c.l.b16 %v1085_v63  ;;  %v1118_v3 = vunpack.c.l.b16 %v1084_v0 }
 0x4c7   : > { %v2665_v5 = vpack.c.b16 %v1119_v1, %v1118_v3 }
 0x4c8   : > { %v1999_v6 = vpop.permute.xlu2 %1998 }
 0x4c9   : > { %v2000_v8 = vunpack.i.l.bf16 %v1999_v6  ;;  %1121 = vrot.lane.b32.xlu2 %v2665_v5, %s2348_s3 }
 0x4cb   : > { %v1086_v10 = vpack.c.bf16 %v2000_v8, %v2000_v8 }
 0x4cd   : > { %v1144_v12 = vunpack.c.l.b16 %v1086_v10 }
 0x4d0   : > { %v958_v22 = vpop.xlane.xlu0 %957 }
 0x4d1   : > { %v966_v23 = vmul.f32 %v2631_v21, %v958_v22 }
 0x4d3   : > { %v967_v24 = vsub.f32 %v955_v7, %v966_v23  ;;  %v2001_v7 = vunpack.i.h.bf16 %v1999_v6 }
 0x4d5   : > { %v968_v25 = vmul.f32 %v967_v24, %v967_v24  ;;  %v1087_v9 = vpack.c.bf16 %v2001_v7, %v2001_v7 }
 0x4d7   : > { %v969_v19 = vsel %vm591_vm0, %v968_v25, 0.0  ;;  %v1145_v11 = vunpack.c.l.b16 %v1087_v9 }
 0x4d8   : > { %970 = vadd.xlane.f32.xlu1 %v969_v19 }
 0x4d9   : > { %v1146_v13 = vpack.c.b16 %v1145_v11, %v1144_v12 }
 0x4db   : > { %1147 = vrot.lane.b32.xlu2 %v1146_v13, %s2348_s3 }
 0x4e3   : > { %v1096_v15 = vpop.permute.xlu0 %1095 }
 0x4e4   : > { %v1101_v2 = vsel %vm635_vm1, %v1096_v15, 0 }
 0x4e5   : > { %1110 = vmatpush.bf16.xpose.msrb.mxu3 %v1101_v2 }
 0x51b   : > { %v1174_v23 = vpop.permute.xlu2 %1173 }
 0x523   : > { %v1122_v25 = vpop.permute.xlu2 %1121 }
 0x524   : > { %v1127_v19 = vsel %vm635_vm1, %v1122_v25, 0 }
 0x525   : > { %1136 = vmatpush.bf16.xpose.msra.mxu0 %v1127_v19 }
 0x535   : > { %v1148_v26 = vpop.permute.xlu2 %1147 }
 0x536   : > { %v1153_v27 = vsel %vm635_vm1, %v1148_v26, 0 }
 0x537   : > { %1162 = vmatpush.bf16.xpose.msra.mxu1 %v1153_v27 }
 0x54b   : > { %v971_v30 = vpop.xlane.xlu1 %970 }
 0x54c   : > { %v972_v32 = vmul.f32 %v971_v30, %v2631_v21 }
 0x54e   : > { %v973_v36 = vadd.f32 1e-05, %v972_v32 }
 0x550   : > { %2023 = vrsqrt.f32 %v973_v36  ;;  %vm980_vm5 = vweird.f32 %v973_v36 }
 0x556   : > { %v2024_v39 = vpop.eup %2023 }
 0x557   : > { %v975_v40 = vmul.f32 %v2024_v39, %v973_v36  ;;  %vm981_vm4 = vweird.f32 %v2024_v39 }
 0x558   : > { %vm982_vm6 = vmor %vm980_vm5, %vm981_vm4 }
 0x559   : > { %v976_v41 = vmul.f32 %v2024_v39, %v975_v40 }
 0x55b   : > { %v977_v42 = vmul.f32 0.5, %v976_v41 }
 0x55d   : > { %v978_v43 = vsub.f32 1.5, %v977_v42 }
 0x55f   : > { %v979_v44 = vmul.f32 %v2024_v39, %v978_v43 }
 0x561   : > { %v983_v46 = vsel %vm982_vm6, %v2024_v39, %v979_v44 }
 0x562   : > { %v984_v48 = vmul.f32 %v983_v46, %v967_v24  ;;  %v1179_v24 = vsel %vm635_vm1, %v1174_v23, 0 }
 0x563   : > { %1188 = vmatpush.bf16.xpose.msra.mxu2 %v1179_v24 }
 0x564   : > { %v986_v49 = vmul.f32 %v2650_v45, %v984_v48 }
 0x566   : > { %v2656_v50 = vadd.f32 %v2652_v47, %v986_v49 }
 0x568   : > { %v994_v51 = vpack.c.bf16 %v2656_v50, %v2656_v50 }
 0x56a   : > { %1812 = vmatmul.msk.bf16.vlgmr.msrb.gmra.mxu1 %vm591_vm0, %v994_v51 }
 0x5e7   : > { %v1022_v16 = vpop.f32.mrf.mxu1 }
 0x5e8   : > { %v1023_v17 = vadd.f32 %v2638_v14, %v1022_v16 }
 0x5ea   : > { %v1054_v18 = vmul.f32 0.35355338, %v1023_v17  ;;  %1048 = vrot.lane.b32.xlu2 %v1023_v17, %s2347_s24  ;;  %1045 = vrot.lane.b32.xlu0 %v1023_v17, %s2346_s30 }
 0x5eb   : > { %1051 = vrot.lane.b32.xlu1 %v1023_v17, %s2345_s19  ;;  %v1323_v17 = vld [vmem:[#allocation10] sm:$0xf]  ;;  %s2239_s19 = sshra.s32 %s1595_s22, 4  ;;  %s2240_s19 = int_to_ptr.hbm [resolvable:$true] %s2239_s19 }
 0x5ec   : > { %v1078_v20 = vpack.c.bf16 %v1054_v18, %v1054_v18  ;;  %v1331_v18 = vsel %vm780_vm2, %v1323_v17, 0  ;;  %s2241_s30 = scalar_lea.hbm %s2240_s19, 32  ;;  %p2246_p3 = scmp.lt.s32.totalorder %s2240_s19, %s2822_s13 }
 0x5ed   : > { %p2242_p0 = scmp.ne.s32.totalorder %s2240_s19, %s2241_s30 }
 0x5ee   : > { %1814 = vmatmul.msk.bf16.vlgmr.msrb.gmra.mxu3 %vm635_vm1, %v1078_v20 }
 0x5ef   : > { %v1024_v22 = vpop.f32.mrf.mxu1  ;;  %p2243_p1 = pnand %p2242_p0, %p2462_p5 }
 0x5f1   : > { %p2244_p2 = pneg %p2243_p1 }
 0x644   : > { %v1049_v28 = vpop.permute.xlu2 %1048 }
 0x645   : > { %v1056_v29 = vmul.f32 0.35355338, %v1049_v28 }
 0x647   : > { %v1080_v30 = vpack.c.bf16 %v1056_v29, %v1056_v29 }
 0x649   : > { %1816 = vmatmul.msk.bf16.vlgmr.msra.gmra.mxu1 %vm635_vm1, %v1080_v30 }
 0x65c   : > { %v1046_v31 = vpop.permute.xlu0 %1045 }
 0x65d   : > { %v1055_v32 = vmul.f32 0.35355338, %v1046_v31  ;;  %v1052_v33 = vpop.permute.xlu1 %1051 }
 0x65e   : > { %v1057_v34 = vmul.f32 0.35355338, %v1052_v33 }
 0x65f   : > { %v1079_v35 = vpack.c.bf16 %v1055_v32, %v1055_v32 }
 0x660   : > { %v1081_v36 = vpack.c.bf16 %v1057_v34, %v1057_v34  ;;  %v1325_v34 = vld [vmem:[#allocation10 + $0x8] sm:$0xf] }
 0x661   : > { %1815 = vmatmul.msk.bf16.vlgmr.msra.gmra.mxu0 %vm635_vm1, %v1079_v35  ;;  %v1369_v35 = vsel %vm780_vm2, %v1325_v34, 0 }
 0x662   : > { %1817 = vmatmul.msk.bf16.vlgmr.msra.gmra.mxu2 %vm635_vm1, %v1081_v36  ;;  %v1326_v36 = vld [vmem:[#allocation10 + $0xc] sm:$0xf] }
 0x671   : > { %v1112_v37 = vpop.f32.mrf.mxu3 }
 0x672   : > { %v1195_v39 = vsel %vm1194_vm7, %v1112_v37, -inf }
 0x673   : > { %1196 = vmax.xlane.f32.xlu0 %v1195_v39  ;;  %v1324_v39 = vld [vmem:[#allocation10 + $0x4] sm:$0xf] }
 0x679   : > { %v1114_v40 = vpop.f32.mrf.mxu3 }
 0x67a   : > { %v1350_v40 = vsel %vm780_vm2, %v1324_v39, 0 }
 0x6c6   : > { %v1164_v41 = vpop.f32.mrf.mxu1 }
 0x6c7   : > { %v1201_v42 = vsel %vm1194_vm7, %v1164_v41, -inf }
 0x6c8   : > { %1202 = vmax.xlane.f32.xlu0 %v1201_v42 }
 0x6ce   : > { %v1166_v4 = vpop.f32.mrf.mxu1 }
 0x6dc   : > { %1243 = vrot.lane.b32.xlu0 %v2644_v38, %s2349_s27 }
 0x6de   : > { %v1138_v43 = vpop.f32.mrf.mxu0 }
 0x6df   : > { %v1198_v44 = vsel %vm1194_vm7, %v1138_v43, -inf }
 0x6e0   : > { %1199 = vmax.xlane.f32.xlu2 %v1198_v44 }
 0x6e4   : > { %1281 = vrot.lane.b32.xlu0 %v1146_v13, %s2349_s27 }
 0x6e5   : > { %v1190_v46 = vpop.f32.mrf.mxu2 }
 0x6e6   : > { %v1140_v48 = vpop.f32.mrf.mxu0  ;;  %v1204_v49 = vsel %vm1194_vm7, %v1190_v46, -inf  ;;  %v1197_v51 = vpop.xlane.xlu0 %1196 }
 0x6e7   : > { %1205 = vmax.xlane.f32.xlu1 %v1204_v49  ;;  %v1207_v52 = vsub.f32 %v1112_v37, %v1197_v51  ;;  %v1388_v37 = vsel %vm780_vm2, %v1326_v36, 0 }
 0x6e9   : > { %v1211_v53 = vmul.f32 1.442695, %v1207_v52 }
 0x6eb   : > { %2025 = vpow2.f32 %v1211_v53 }
 0x6ec   : > { %1410 = vrot.lane.b32.xlu0 %v2638_v14, %s2350_s28 }
 0x6ed   : > { %v1192_v54 = vpop.f32.mrf.mxu2 }
 0x6f1   : > { %v2026_v38 = vpop.eup %2025 }
 0x6f2   : > { %v1219_v55 = vsel %vm1194_vm7, %v2026_v38, 0.0 }
 0x6f3   : > { %1220 = vadd.xlane.f32.xlu1 %v1219_v55 }
 0x73b   : > { %v1203_v56 = vpop.xlane.xlu0 %1202 }
 0x73c   : > { %v1209_v61 = vsub.f32 %v1164_v41, %v1203_v56 }
 0x73e   : > { %v1215_v0 = vmul.f32 1.442695, %v1209_v61 }
 0x74e   : > { %v1244_v57 = vpop.permute.xlu0 %1243 }
 0x74f   : > { %1256 = vmatpush.bf16.msra.mxu3 %v1244_v57 }
 0x753   : > { %v1200_v58 = vpop.xlane.xlu2 %1199  ;;  %1340 = vmatpush.bf16.msrb.mxu3 %v1331_v18 }
 0x754   : > { %v1208_v60 = vsub.f32 %v1138_v43, %v1200_v58 }
 0x756   : > { %v1213_v62 = vmul.f32 1.442695, %v1208_v60  ;;  %v1282_v63 = vpop.permute.xlu0 %1281 }
 0x757   : > { %1294 = vmatpush.bf16.msrb.mxu1 %v1282_v63 }
 0x758   : > { %2027 = vpow2.f32 %v1213_v62 }
 0x759   : > { %2029 = vpow2.f32 %v1215_v0 }
 0x75a   : > { %v1206_v1 = vpop.xlane.xlu1 %1205 }
 0x75b   : > { %v1210_v3 = vsub.f32 %v1190_v46, %v1206_v1  ;;  %1378 = vmatpush.bf16.msra.mxu1 %v1369_v35 }
 0x75d   : > { %v1217_v14 = vmul.f32 1.442695, %v1210_v3 }
 0x75e   : > { %v2028_v6 = vpop.eup %2027  ;;  %v1411_v1 = vpop.permute.xlu0 %1410 }
 0x75f   : > { %2031 = vpow2.f32 %v1217_v14  ;;  %v1222_v7 = vsel %vm1194_vm7, %v2028_v6, 0.0  ;;  %v2030_v8 = vpop.eup %2029 }
 0x760   : > { %1223 = vadd.xlane.f32.xlu1 %v1222_v7  ;;  %v1225_v12 = vsel %vm1194_vm7, %v2030_v8, 0.0 }
 0x765   : > { %v2032_v9 = vpop.eup %2031 }
 0x766   : > { %v1228_v10 = vsel %vm1194_vm7, %v2032_v9, 0.0  ;;  %v1221_v11 = vpop.xlane.xlu1 %1220 }
 0x767   : > { %1229 = vadd.xlane.f32.xlu2 %v1228_v10  ;;  %2033 = vrcp.f32 %v1221_v11 }
 0x768   : > { %1226 = vadd.xlane.f32.xlu1 %v1225_v12 }
 0x76d   : > { %v2034_v13 = vpop.eup %2033 }
 0x76e   : > { %v1235_v15 = vmul.f32 %v2034_v13, %v2026_v38 }
 0x770   : > { %v1239_v2 = vpack.c.bf16 %v1235_v15, %v1235_v15  ;;  %1556 = vst.msk [vmem:[%s2699_s21] sm:$0xff] %vm1194_vm7, %v1235_v15  ;;  %v1865_v15 = vld [vmem:[#allocation11 + $0x8] sm:$0xff] }
 0x772   : > { %1818 = vmatmul.msk.bf16.vlgmr.msra.gmra.mxu3 %vm1194_vm7, %v1239_v2  ;;  %v1864_v2 = vld [vmem:[#allocation11] sm:$0xff] }
 0x773   : > { %1469 = vmatpush.bf16.msra.mxu3 %v1865_v15 }
 0x777   : > { %1470 = vmatpush.bf16.msra.mxu3 %v1864_v2 }
 0x77f   : > { %1300 = vrot.lane.b32.xlu2 %v2661_v59, %s2349_s27 }
 0x781   : > { %1262 = vrot.lane.b32.xlu1 %v2665_v5, %s2349_s27 }
 0x7d3   : > { %v1224_v16 = vpop.xlane.xlu1 %1223 }
 0x7d4   : > { %2035 = vrcp.f32 %v1224_v16  ;;  %v1869_v16 = vld [vmem:[%s2819_s10 + $0x18] sm:$0xff] }
 0x7da   : > { %v2036_v20 = vpop.eup %2035  ;;  %v1230_v22 = vpop.xlane.xlu2 %1229 }
 0x7db   : > { %v1236_v23 = vmul.f32 %v2036_v20, %v2028_v6  ;;  %2037 = vrcp.f32 %v1230_v22  ;;  %v1227_v24 = vpop.xlane.xlu1 %1226  ;;  %v1868_v20 = vld [vmem:[%s2819_s10 + $0x10] sm:$0xff] }
 0x7dc   : > { %2039 = vrcp.f32 %v1227_v24 }
 0x7dd   : > { %1557 = vst.msk [vmem:[%s2699_s21 + $0x8] sm:$0xff] %vm1194_vm7, %v1236_v23  ;;  %v1240_v30 = vpack.c.bf16 %v1236_v23, %v1236_v23 }
 0x7e1   : > { %v2038_v59 = vpop.eup %2037 }
 0x7e2   : > { %v2040_v25 = vpop.eup %2039  ;;  %v1238_v19 = vmul.f32 %v2038_v59, %v2032_v9  ;;  %v1301_v5 = vpop.permute.xlu2 %1300 }
 0x7e3   : > { %v1237_v26 = vmul.f32 %v2040_v25, %v2030_v8  ;;  %1313 = vmatpush.bf16.msrb.mxu2 %v1301_v5 }
 0x7e4   : > { %v1242_v27 = vpack.c.bf16 %v1238_v19, %v1238_v19  ;;  %1559 = vst.msk [vmem:[%s2699_s21 + $0x18] sm:$0xff] %vm1194_vm7, %v1238_v19 }
 0x7e5   : > { %v1241_v28 = vpack.c.bf16 %v1237_v26, %v1237_v26  ;;  %1558 = vst.msk [vmem:[%s2699_s21 + $0x10] sm:$0xff] %vm1194_vm7, %v1237_v26 }
 0x7e6   : > { %1821 = vmatmul.msk.bf16.vlgmr.msrb.gmra.mxu2 %vm1194_vm7, %v1242_v27 }
 0x7e7   : > { %1820 = vmatmul.msk.bf16.vlgmr.msrb.gmra.mxu1 %vm1194_vm7, %v1241_v28  ;;  %1397 = vmatpush.bf16.msra.mxu2 %v1388_v37 }
 0x7f3   : > { %v1263_v29 = vpop.permute.xlu1 %1262 }
 0x7f4   : > { %1275 = vmatpush.bf16.msrb.mxu0 %v1263_v29 }
 0x7f5   : > { %v1258_v31 = vpop.f32.mrf.mxu3 }
 0x7f6   : > { %v1319_v32 = vpack.c.bf16 %v1258_v31, %v1258_v31  ;;  %v1867_v31 = vld [vmem:[%s2819_s10 + $0x8] sm:$0xff] }
 0x7f7   : > { %1819 = vmatmul.msk.bf16.vlgmr.msrb.gmra.mxu0 %vm1194_vm7, %v1240_v30 }
 0x7f8   : > { %1822 = vmatmul.msk.bf16.vlgmr.msrb.gmra.mxu3 %vm635_vm1, %v1319_v32  ;;  %1359 = vmatpush.bf16.msra.mxu0 %v1350_v40  ;;  %v1866_v32 = vld [vmem:[%s2819_s10] sm:$0xff] }
 0x7fc   : > { %1521 = vmatpush.bf16.msrb.mxu0 %v1869_v16 }
 0x7fd   : > { %v1260_v33 = vpop.f32.mrf.mxu3 }
 0x800   : > { %1522 = vmatpush.bf16.msrb.mxu0 %v1868_v20 }
 0x804   : > { %1523 = vmatpush.bf16.msrb.mxu0 %v1867_v31 }
 0x808   : > { %1524 = vmatpush.bf16.msrb.mxu0 %v1866_v32 }
 0x864   : > { %v1296_v41 = vpop.f32.mrf.mxu1 }
 0x865   : > { %v1321_v42 = vpack.c.bf16 %v1296_v41, %v1296_v41 }
 0x867   : > { %1824 = vmatmul.msk.bf16.vlgmr.msra.gmra.mxu1 %vm635_vm1, %v1321_v42 }
 0x869   : > { %v1315_v4 = vpop.f32.mrf.mxu2 }
 0x86a   : > { %v1322_v43 = vpack.c.bf16 %v1315_v4, %v1315_v4 }
 0x86c   : > { %1825 = vmatmul.msk.bf16.vlgmr.msra.gmra.mxu2 %vm635_vm1, %v1322_v43  ;;  %v1298_v44 = vpop.f32.mrf.mxu1 }
 0x871   : > { %v1317_v46 = vpop.f32.mrf.mxu2 }
 0x874   : > { %v1277_v48 = vpop.f32.mrf.mxu0 }
 0x875   : > { %v1320_v49 = vpack.c.bf16 %v1277_v48, %v1277_v48 }
 0x877   : > { %1823 = vmatmul.msk.bf16.vlgmr.msra.gmra.mxu0 %vm635_vm1, %v1320_v49 }
 0x87b   : > { %v1342_v51 = vpop.f32.mrf.mxu3 }
 0x87c   : > { %v1279_v52 = vpop.f32.mrf.mxu0  ;;  %v1403_v57 = vsel %vm591_vm0, %v1342_v51, 0.0 }
 0x883   : > { %v1344_v53 = vpop.f32.mrf.mxu3 }
 0x8e4   : > { %v1380_v54 = vpop.f32.mrf.mxu1 }
 0x8e5   : > { %v1406_v61 = vsel %vm591_vm0, %v1380_v54, 0.0 }
 0x8ec   : > { %v1382_v38 = vpop.f32.mrf.mxu1 }
 0x8ef   : > { %v1399_v55 = vpop.f32.mrf.mxu2 }
 0x8f0   : > { %v1408_v0 = vsel %vm591_vm0, %v1399_v55, 0.0 }
 0x8f4   : > { %v1361_v56 = vpop.f32.mrf.mxu0 }
 0x8f5   : > { %v1404_v58 = vsel %vm591_vm0, %v1361_v56, 0.0 }
 0x8f6   : > { %v1405_v60 = vadd.f32 %v1404_v58, %v1403_v57 }
 0x8f7   : > { %v1401_v62 = vpop.f32.mrf.mxu2 }
 0x8f8   : > { %v1407_v63 = vadd.f32 %v1406_v61, %v1405_v60 }
 0x8fa   : > { %v1409_v3 = vadd.f32 %v1408_v0, %v1407_v63 }
 0x8fc   : > { %v1413_v14 = vadd.f32 %v1411_v1, %v1409_v3  ;;  %v1363_v6 = vpop.f32.mrf.mxu0 }
 0x8fe   : > { %v1414_v7 = vadd.f32 %v1413_v14, %v2656_v50  ;;  %v2004_v50 = vld [vmem:[%s2820_s11] ss:$0 sm:$0xff] }
 0x8ff   : > { %1510 = vrot.lane.b32.xlu1 %v2004_v50, %s2349_s27  ;;  %s2245_s27 = scalar_lea.hbm %s2822_s13, 64 }
 0x900   : > { %v1415_v8 = vsel %vm591_vm0, %v1414_v7, 0.0  ;;  %p2247_p4 = scmp.lt.s32.totalorder %s2245_s27, %s2241_s30 }
 0x901   : > { %1416 = vadd.xlane.f32.xlu2 %v1415_v8 }
 0x902   : > { %p2248_p7 = por %p2247_p4, %p2246_p3 }
 0x904   : > { %p2249_p8 = pnand %p2248_p7, %p2244_p2 }
 0x971   : > { %v1511_v39 = vpop.permute.xlu1 %1510 }
 0x974   : > { %v1417_v9 = vpop.xlane.xlu2 %1416 }
 0x975   : > { %v1418_v10 = vmul.f32 %v1417_v9, %v2631_v21 }
 0x977   : > { %v1419_v11 = vsub.f32 %v1414_v7, %v1418_v10 }
 0x979   : > { %v1420_v12 = vmul.f32 %v1419_v11, %v1419_v11 }
 0x97b   : > { %v1421_v13 = vsel %vm591_vm0, %v1420_v12, 0.0 }
 0x97c   : > { %1422 = vadd.xlane.f32.xlu0 %v1421_v13 }
 0x9ef   : > { %v1423_v17 = vpop.xlane.xlu0 %1422 }
 0x9f0   : > { %v1424_v18 = vmul.f32 %v1423_v17, %v2631_v21 }
 0x9f2   : > { %v1425_v22 = vadd.f32 1e-05, %v1424_v18 }
 0x9f4   : > { %2041 = vrsqrt.f32 %v1425_v22  ;;  %vm1432_vm9 = vweird.f32 %v1425_v22 }
 0x9fa   : > { %v2042_v23 = vpop.eup %2041 }
 0x9fb   : > { %v1427_v24 = vmul.f32 %v2042_v23, %v1425_v22  ;;  %vm1433_vm8 = vweird.f32 %v2042_v23 }
 0x9fc   : > { %vm1434_vm10 = vmor %vm1432_vm9, %vm1433_vm8 }
 0x9fd   : > { %v1428_v59 = vmul.f32 %v2042_v23, %v1427_v24 }
 0x9ff   : > { %v1429_v25 = vmul.f32 0.5, %v1428_v59 }
 0xa01   : > { %v1430_v19 = vsub.f32 1.5, %v1429_v25 }
 0xa03   : > { %v1431_v5 = vmul.f32 %v2042_v23, %v1430_v19 }
 0xa05   : > { %v1435_v26 = vsel %vm1434_vm10, %v2042_v23, %v1431_v5 }
 0xa06   : > { %v1436_v27 = vmul.f32 %v1435_v26, %v1419_v11 }
 0xa08   : > { %v1437_v28 = vmul.f32 %v1436_v27, %v2650_v45 }
 0xa0a   : > { %v1438_v29 = vadd.f32 %v1437_v28, %v2652_v47 }
 0xa0c   : > { %v1440_v30 = vpack.c.bf16 %v1438_v29, %v1438_v29 }
 0xa0e   : > { %1834 = vmatmul.msk.bf16.vlgmr.msra.gmra.mxu3 %vm591_vm0, %v1440_v30 }
 0xa91   : > { %v1472_v33 = vpop.f32.mrf.mxu3 }
 0xa92   : > { %v1473_v34 = vadd.f32 %v2004_v50, %v1472_v33 }
 0xa94   : > { %v1476_v35 = vmax.f32 %v1473_v34, 0.0 }
 0xa96   : > { %v1477_v36 = vpack.c.bf16 %v1476_v35, %v1476_v35 }
 0xa98   : > { %1851 = vmatmul.msk.bf16.vlgmr.msrb.gmra.mxu0 %vm1513_vm11, %v1477_v36 }
 0xa99   : > { %v1474_v37 = vpop.f32.mrf.mxu3 }
 0xb15   : > { %v1526_v40 = vpop.f32.mrf.mxu0 }
 0xb16   : > { %v1527_v41 = vadd.f32 %v1526_v40, %v1511_v39 }
 0xb18   : > { %v1530_v42 = vadd.f32 %v1527_v41, %v1438_v29 }
 0xb1a   : > { %v1531_v4 = vsel %vm591_vm0, %v1530_v42, 0.0 }
 0xb1b   : > { %1532 = vadd.xlane.f32.xlu1 %v1531_v4 }
 0xb1d   : > { %v1528_v43 = vpop.f32.mrf.mxu0 }
 0xb8e   : > { %v1533_v44 = vpop.xlane.xlu1 %1532 }
 0xb8f   : > { %v1534_v46 = vmul.f32 %v1533_v44, %v2631_v21 }
 0xb91   : > { %v1535_v48 = vsub.f32 %v1530_v42, %v1534_v46 }
 0xb93   : > { %v1536_v49 = vmul.f32 %v1535_v48, %v1535_v48 }
 0xb95   : > { %v1537_v51 = vsel %vm591_vm0, %v1536_v49, 0.0 }
 0xb96   : > { %1538 = vadd.xlane.f32.xlu2 %v1537_v51 }
 0xb97   : > { %2252 = shalt.err (!%p2249_p8)
}
 0xb98   : > { %s2352_s21 = smov 128   ;;  %s2353_s25 = smov 8  }
 0xb99   : > { %1896 = dma.vmem_to_hbm [thread:$0]  (%p2462_p5), %s1593_s15, 512, %s1595_s22, %s1566_s14, %s2352_s21, %s2352_s21, %s2353_s25  }
 0xb9a   : > { %s1778_s16 = sshll.u32 %s2696_s20, 3  ;;  %s1854_s23 = sshll.u32 %s2445_s29, 3 }
 0xb9b   : > { %s1576_s15 = scalar_lea.hbm %s2821_s12, %s1854_s23  ;;  %s548_s22 = scalar_lea.vmem [#allocation13], %s1778_s16 }
 0xb9c   : > { %s1578_s14 = sshll.u32 %s548_s22, 4  ;;  %s1580_s19 = sshll.u32 %s1576_s15, 4  ;;  %s1579_s14 = int_to_ptr.vmem [resolvable:$true] %s1578_s14  ;;  %s1581_s19 = int_to_ptr.hbm [resolvable:$true] %s1580_s19 }
 0xb9d   : > { %s1561_s29 = scalar_lea.sflag [#allocation4], %s2696_s20  ;;  %s2267_s30 = sshra.s32 %s1581_s19, 4  ;;  %s2268_s30 = int_to_ptr.hbm [resolvable:$true] %s2267_s30 }
 0xb9e   : > { %s2269_s24 = scalar_lea.hbm %s2268_s30, 8  ;;  %s2273_s28 = scalar_lea.hbm %s2821_s12, 16 }
 0xb9f   : > { %p2270_p9 = scmp.ne.s32.totalorder %s2268_s30, %s2269_s24  ;;  %p2274_p12 = scmp.lt.s32.totalorder %s2268_s30, %s2821_s12 }
 0xba0   : > { %p2275_p13 = scmp.lt.s32.totalorder %s2273_s28, %s2269_s24 }
 0xba1   : > { %p2271_p10 = pnand %p2270_p9, %p2462_p5 }
 0xba2   : > { %p2276_p0 = por %p2275_p13, %p2274_p12 }
 0xba3   : > { %p2272_p11 = pneg %p2271_p10 }
 0xba5   : > { %p2277_p1 = pnand %p2276_p0, %p2272_p11 }
 0xc09   : > { %v1539_v52 = vpop.xlane.xlu2 %1538 }
 0xc0a   : > { %v1540_v53 = vmul.f32 %v1539_v52, %v2631_v21 }
 0xc0c   : > { %v1541_v54 = vadd.f32 1e-05, %v1540_v53 }
 0xc0e   : > { %2043 = vrsqrt.f32 %v1541_v54  ;;  %vm1548_vm13 = vweird.f32 %v1541_v54 }
 0xc14   : > { %v2044_v38 = vpop.eup %2043 }
 0xc15   : > { %v1543_v55 = vmul.f32 %v2044_v38, %v1541_v54  ;;  %vm1549_vm12 = vweird.f32 %v2044_v38 }
 0xc16   : > { %vm1550_vm14 = vmor %vm1548_vm13, %vm1549_vm12 }
 0xc17   : > { %v1544_v56 = vmul.f32 %v2044_v38, %v1543_v55 }
 0xc19   : > { %v1545_v57 = vmul.f32 0.5, %v1544_v56 }
 0xc1b   : > { %v1546_v58 = vsub.f32 1.5, %v1545_v57 }
 0xc1d   : > { %v1547_v60 = vmul.f32 %v2044_v38, %v1546_v58 }
 0xc1f   : > { %v1551_v21 = vsel %vm1550_vm14, %v2044_v38, %v1547_v60 }
 0xc20   : > { %v1552_v61 = vmul.f32 %v1551_v21, %v1535_v48 }
 0xc22   : > { %v1553_v62 = vmul.f32 %v1552_v61, %v2650_v45 }
 0xc24   : > { %v1554_v63 = vadd.f32 %v1553_v62, %v2652_v47 }
 0xc26   : > { %1555 = vst.msk [vmem:[%s548_s22] sm:$0xff] %vm591_vm0, %v1554_v63 }
 0xc27   : > { %2280 = shalt.err (!%p2277_p1)
}
 0xc28   : > { %1895 = dma.vmem_to_hbm [thread:$0]  (%p2462_p5), %s1579_s14, 128, %s1581_s19, %s1561_s29  }
 0xc29 PF: > { %s2845_s20 = sld [smem:[#allocation24_spill]] }
 0xc2a   : > { %s2846_s25 = sld [smem:[#allocation22_spill]] }
 0xc2f   : > { %p1937_p2 = scmp.ge.s32.totalorder %s2845_s20, 2 }
 0xc30   : > { %s1609_s23 = sand.u32 1, %s2846_s25  }
 0xc31   : > { %p1919_p3 = pnand %p1937_p2, %p2466_p6  ;;  %s1610_s2 = scalar_lea.sflag [#allocation4], %s1609_s23 }
 0xc33   : > { %p1920_p4 = pneg %p1919_p3 }
 0xc35   : > { %2314 = dma.done.wait (%p1920_p4), %s1610_s2, 128  }
 0xc36   : > { %2316 = vsyncadd (%p1920_p4), %s1610_s2, 4294967168  ;;  %s1620_s6 = scalar_lea.sflag [#allocation15], %s1609_s23 }
 0xc37   : > { %2318 = dma.done.wait (%p1920_p4), %s1620_s6, 512  }
 0xc38   : > { %2320 = vsyncadd (%p1920_p4), %s1620_s6, 4294966784  ;;  %s2848_s28 = sld [smem:[#allocation25_spill]]  ;;  %s2851_s25 = smov %s2327_s26 }
 0xc39   : > { %s2849_s15 = sld [smem:[#allocation23_spill]] }
 0xc3a   : > { %s2850_s27 = sld [smem:[#allocation26_spill]] }
 0xc3e   : > { %p31_p5 = scmp.ge.s32.totalorder %s2848_s28, 4  }
 0xc3f   : > { %s2852_s26 = smov %s2849_s15 }
 0xc40   :  { %33 = sbr.rel (!%p31_p5) target bundleno = 13 (0xd), region = 148 }
 0xc45   :  { %1626 = vsyncpa [#allocation3], 1 }
 0xc46   :  { %1628 = vsyncpa [#allocation3 + $0x1], 1 }
 0xc47   :  { %1629 = vsyncpa [#allocation6], 1 }
 0xc48   :  { %1630 = vsyncpa [#allocation9], 1 }
 0xc49   :  { %1631 = vsyncpa [#allocation12], 1 }
 0xc4a   :  { %1632 = vsyncpa [#allocation4], 1 }
 0xc4b   :  { %1634 = vsyncpa [#allocation4 + $0x1], 1 }
 0xc4c   :  { %1635 = vsyncpa [#allocation15], 1 }
 0xc4d   :  { %1637 = vsyncpa [#allocation15 + $0x1], 1 }

</bundles_post_ra>
